<compile_context>
chip_gen: v7x
topology: tpu7x:2x2x1
jax: 0.10.0
libtpu: 0.0.40
codegen_flags: <defaults>
</compile_context>

<pallas_src>
import functools

import jax
import jax.numpy as jnp
from jax.experimental import pallas as pl
from jax.experimental.pallas import tpu as pltpu


LANE = 128


def _round_up(x, m):
    return ((x + m - 1) // m) * m


def _bottleneck_kernel(x_ref, w1_ref, b1_ref, w2_ref, b2_ref, w3_ref, b3_ref,
                       o_ref, h1pad_ref, *, H, W, Cp):
    """Fused Bottleneck forward for one batch element.

    x_ref : (1, H*W, Cp)    channel-padded NHWC activations, spatially flattened
    w1_ref: (Cp, Cp)        conv1 (1x1) weight with BN1 scale folded in
    b1_ref: (1, Cp)         BN1 shift
    w2_ref: (9, Cp, Cp)     conv2 (3x3) weights, tap-major, BN2 folded in
    b2_ref: (1, Cp)         BN2 shift
    w3_ref: (Cp, Cp)        conv3 (1x1) weight with BN3 folded in
    b3_ref: (1, Cp)         BN3 shift
    o_ref : (1, H*W, Cp)
    h1pad_ref: (H+2, W+2, Cp) f32 VMEM scratch (conv1 output with zero halo)
    """
    HW = H * W
    x2d = x_ref[0]                                          # (HW, Cp)

    # ---- conv1 (1x1) + bn1 + relu : one lane-dense MXU matmul --------------
    h1 = jnp.dot(x2d, w1_ref[...], preferred_element_type=jnp.float32)
    h1 = jnp.maximum(h1 + b1_ref[...], 0.0)                 # (HW, Cp) f32

    # ---- conv2 (3x3, stride 1, pad 1) + bn2 + relu --------------------------
    # Stage conv1's output into a zero-haloed VMEM scratch; each of the nine
    # taps is then a shifted (HW, Cp) x (Cp, Cp) matmul accumulated in f32.
    h1pad_ref[...] = jnp.zeros_like(h1pad_ref)
    h1pad_ref[1:H + 1, 1:W + 1, :] = h1.reshape(H, W, Cp)

    acc = jnp.zeros((HW, Cp), dtype=jnp.float32)
    for kh in range(3):
        for kw in range(3):
            patch = h1pad_ref[kh:kh + H, kw:kw + W, :].reshape(HW, Cp)
            acc = acc + jnp.dot(patch, w2_ref[kh * 3 + kw],
                                preferred_element_type=jnp.float32)
    h2 = jnp.maximum(acc + b2_ref[...], 0.0)                # (HW, Cp)

    # ---- conv3 (1x1) + bn3, residual add, relu ------------------------------
    h3 = jnp.dot(h2, w3_ref[...], preferred_element_type=jnp.float32)
    h3 = h3 + b3_ref[...]
    out = jnp.maximum(h3 + x2d.astype(jnp.float32), 0.0)
    o_ref[0] = out.astype(o_ref.dtype)


class BottleneckPallas:
    """JAX/Pallas port of the PyTorch Bottleneck forward pass (inference BN)."""

    expansion = 4

    def __init__(self, inplanes, planes, key, stride=1, downsample=None,
                 eps=1e-5):
        if stride != 1 or downsample is not None:
            raise NotImplementedError(
                "only the module defaults (stride=1, downsample=None) are "
                "supported")
        self.inplanes = inplanes
        self.planes = planes
        self.cout = planes * self.expansion
        self.eps = eps

        keys = iter(jax.random.split(key, 16))

        def conv_w(shape, fan_in):
            return (jax.random.normal(next(keys), shape, jnp.float32)
                    * jnp.sqrt(2.0 / fan_in))

        def bn_params(c):
            gamma = 1.0 + 0.1 * jax.random.normal(next(keys), (c,), jnp.float32)
            beta = 0.1 * jax.random.normal(next(keys), (c,), jnp.float32)
            mean = 0.1 * jax.random.normal(next(keys), (c,), jnp.float32)
            var = 1.0 + 0.1 * jax.random.uniform(next(keys), (c,), jnp.float32)
            return gamma, beta, mean, var

        # Raw parameters (HWIO weight layout, matching the NHWC lax reference).
        self.w1_raw = conv_w((1, 1, inplanes, planes), inplanes)
        self.w2_raw = conv_w((3, 3, planes, planes), 9 * planes)
        self.w3_raw = conv_w((1, 1, planes, self.cout), planes)
        self.bn1 = bn_params(planes)
        self.bn2 = bn_params(planes)
        self.bn3 = bn_params(self.cout)

        # ---- fold BN (inference mode) into the convs and pad channels to 128
        self.Cp = _round_up(max(inplanes, planes, self.cout), LANE)
        Cp = self.Cp

        def fold(w_hwio, bn):
            gamma, beta, mean, var = bn
            scale = gamma / jnp.sqrt(var + eps)
            return w_hwio * scale, beta - mean * scale

        w1, b1 = fold(self.w1_raw, self.bn1)
        w2, b2 = fold(self.w2_raw, self.bn2)
        w3, b3 = fold(self.w3_raw, self.bn3)

        def pad_mat(w2d, cin, cout_):
            return jnp.zeros((Cp, Cp), jnp.float32).at[:cin, :cout_].set(w2d)

        def pad_bias(b, cout_):
            return jnp.zeros((1, Cp), jnp.float32).at[0, :cout_].set(b)

        self.W1p = pad_mat(w1[0, 0], inplanes, planes)
        self.b1p = pad_bias(b1, planes)
        self.W2p = (jnp.zeros((9, Cp, Cp), jnp.float32)
                    .at[:, :planes, :planes].set(w2.reshape(9, planes, planes)))
        self.b2p = pad_bias(b2, planes)
        self.W3p = pad_mat(w3[0, 0], planes, self.cout)
        self.b3p = pad_bias(b3, self.cout)

    def __call__(self, x_nchw):
        N, Cin, H, W = x_nchw.shape
        assert Cin == self.inplanes == self.cout, "residual add requires Cin == planes*4"
        Cp = self.Cp
        HW = H * W

        # NCHW -> NHWC, zero-pad channels to the 128-lane width, flatten spatial.
        x_nhwc = jnp.transpose(x_nchw, (0, 2, 3, 1))
        x_p = jnp.pad(x_nhwc, ((0, 0), (0, 0), (0, 0), (0, Cp - Cin)))
        x_p = x_p.reshape(N, HW, Cp)

        kernel = functools.partial(_bottleneck_kernel, H=H, W=W, Cp=Cp)
        out = pl.pallas_call(
            kernel,
            out_shape=jax.ShapeDtypeStruct((N, HW, Cp), x_nchw.dtype),
            grid_spec=pltpu.PrefetchScalarGridSpec(
                num_scalar_prefetch=0,
                grid=(N,),
                in_specs=[
                    pl.BlockSpec((1, HW, Cp), lambda n: (n, 0, 0)),
                    pl.BlockSpec((Cp, Cp), lambda n: (0, 0)),
                    pl.BlockSpec((1, Cp), lambda n: (0, 0)),
                    pl.BlockSpec((9, Cp, Cp), lambda n: (0, 0, 0)),
                    pl.BlockSpec((1, Cp), lambda n: (0, 0)),
                    pl.BlockSpec((Cp, Cp), lambda n: (0, 0)),
                    pl.BlockSpec((1, Cp), lambda n: (0, 0)),
                ],
                out_specs=pl.BlockSpec((1, HW, Cp), lambda n: (n, 0, 0)),
                scratch_shapes=[pltpu.VMEM((H + 2, W + 2, Cp), jnp.float32)],
            ),
            compiler_params=pltpu.CompilerParams(
                dimension_semantics=("parallel",),
            ),
        )(x_p, self.W1p, self.b1p, self.W2p, self.b2p, self.W3p, self.b3p)

        out = out.reshape(N, H, W, Cp)[..., :self.cout]
        return jnp.transpose(out, (0, 3, 1, 2))               # NHWC -> NCHW


def _reference_forward(block, x_nchw):
    """Plain-JAX (lax.conv) reference implementing the same math, f32."""
    eps = block.eps
    hi = jax.lax.Precision.HIGHEST

    def bn(h, params):
        gamma, beta, mean, var = params
        return (h - mean) / jnp.sqrt(var + eps) * gamma + beta

    x = jnp.transpose(x_nchw, (0, 2, 3, 1))                   # NHWC
    h = jax.lax.conv_general_dilated(
        x, block.w1_raw, (1, 1), "VALID",
        dimension_numbers=("NHWC", "HWIO", "NHWC"), precision=hi)
    h = jax.nn.relu(bn(h, block.bn1))
    h = jax.lax.conv_general_dilated(
        h, block.w2_raw, (1, 1), [(1, 1), (1, 1)],
        dimension_numbers=("NHWC", "HWIO", "NHWC"), precision=hi)
    h = jax.nn.relu(bn(h, block.bn2))
    h = jax.lax.conv_general_dilated(
        h, block.w3_raw, (1, 1), "VALID",
        dimension_numbers=("NHWC", "HWIO", "NHWC"), precision=hi)
    h = bn(h, block.bn3)
    h = jax.nn.relu(h + x)                                     # residual (downsample=None)
    return jnp.transpose(h, (0, 3, 1, 2))


if __name__ == "__main__":
    key = jax.random.PRNGKey(0)
    key, xkey, pkey = jax.random.split(key, 3)

    # Small config consistent with the module: for downsample=None the residual
    # add requires inplanes == planes * expansion.
    N, H, W = 2, 16, 16
    planes = 4
    inplanes = planes * BottleneckPallas.expansion             # 16

    block = BottleneckPallas(inplanes, planes, key=pkey)
    x = jax.random.normal(xkey, (N, inplanes, H, W), dtype=jnp.float32)

    out = jax.block_until_ready(block(x))
    ref = jax.block_until_ready(_reference_forward(block, x))

    assert out.shape == (N, inplanes, H, W), out.shape
    assert jnp.allclose(out, ref, atol=1e-2, rtol=1e-2), (
        "mismatch vs reference, max abs diff = %g"
        % float(jnp.max(jnp.abs(out - ref))))

    print("KERNEL_OK")
</pallas_src>

<mosaic_0001>
module attributes {stable_mosaic.version = 11 : i64} {
  func.func @_bottleneck_kernel(%arg0: i32, %arg1: memref<1x256x128xf32, #tpu.memory_space<vmem>>, %arg2: memref<128x128xf32, #tpu.memory_space<vmem>>, %arg3: memref<1x128xf32, #tpu.memory_space<vmem>>, %arg4: memref<9x128x128xf32, #tpu.memory_space<vmem>>, %arg5: memref<1x128xf32, #tpu.memory_space<vmem>>, %arg6: memref<128x128xf32, #tpu.memory_space<vmem>>, %arg7: memref<1x128xf32, #tpu.memory_space<vmem>>, %arg8: memref<1x256x128xf32, #tpu.memory_space<vmem>>, %arg9: memref<18x18x128xf32, #tpu.memory_space<vmem>>) attributes {dimension_semantics = [#tpu.dimension_semantics<parallel>], iteration_bounds = array<i64: 2>, scalar_prefetch = 0 : i64, scratch_operands = 1 : i64, tpu.core_type = #tpu.core_type<tc>, window_params = [{transform_indices = @transform_0, window_bounds = array<i64: 1, 256, 128>}, {pipeline_mode = #tpu.pipeline_mode<synchronous>, transform_indices = @transform_1, window_bounds = array<i64: 128, 128>}, {pipeline_mode = #tpu.pipeline_mode<synchronous>, transform_indices = @transform_2, window_bounds = array<i64: 1, 128>}, {pipeline_mode = #tpu.pipeline_mode<synchronous>, transform_indices = @transform_3, window_bounds = array<i64: 9, 128, 128>}, {pipeline_mode = #tpu.pipeline_mode<synchronous>, transform_indices = @transform_4, window_bounds = array<i64: 1, 128>}, {pipeline_mode = #tpu.pipeline_mode<synchronous>, transform_indices = @transform_5, window_bounds = array<i64: 128, 128>}, {pipeline_mode = #tpu.pipeline_mode<synchronous>, transform_indices = @transform_6, window_bounds = array<i64: 1, 128>}, {transform_indices = @transform_7, window_bounds = array<i64: 1, 256, 128>}]} {
    %c0 = arith.constant 0 : index
    %c0_0 = arith.constant 0 : index
    %c0_1 = arith.constant 0 : index
    %0 = vector.load %arg1[%c0, %c0_0, %c0_1] : memref<1x256x128xf32, #tpu.memory_space<vmem>>, vector<1x256x128xf32>
    %1 = vector.shape_cast %0 : vector<1x256x128xf32> to vector<256x128xf32>
    %c0_2 = arith.constant 0 : index
    %c0_3 = arith.constant 0 : index
    %2 = vector.load %arg2[%c0_2, %c0_3] : memref<128x128xf32, #tpu.memory_space<vmem>>, vector<128x128xf32>
    %cst = arith.constant dense<0.000000e+00> : vector<256x128xf32>
    %3 = tpu.matmul %1, %2, %cst {dimension_numbers = #tpu.dot_dimension_numbers<[1], [0], [0], [1], [0, 0, 1, 1], [], []>} : vector<256x128xf32>, vector<128x128xf32>, vector<256x128xf32> -> vector<256x128xf32>
    %c0_4 = arith.constant 0 : index
    %c0_5 = arith.constant 0 : index
    %4 = vector.load %arg3[%c0_4, %c0_5] : memref<1x128xf32, #tpu.memory_space<vmem>>, vector<1x128xf32>
    %5 = vector.broadcast %4 : vector<1x128xf32> to vector<256x128xf32>
    %6 = arith.addf %3, %5 : vector<256x128xf32>
    %cst_6 = arith.constant 0.000000e+00 : f32
    %7 = vector.broadcast %cst_6 : f32 to vector<256x128xf32>
    %8 = arith.maximumf %6, %7 : vector<256x128xf32>
    %cst_7 = arith.constant 0.000000e+00 : f32
    %9 = vector.broadcast %cst_7 : f32 to vector<18x18x128xf32>
    %c0_8 = arith.constant 0 : index
    %c0_9 = arith.constant 0 : index
    %c0_10 = arith.constant 0 : index
    %10 = vector.load %arg9[%c0_8, %c0_9, %c0_10] : memref<18x18x128xf32, #tpu.memory_space<vmem>>, vector<18x18x128xf32>
    tpu.vector_store %arg9[%c0_8, %c0_9, %c0_10], %9 {strides = array<i32>} : memref<18x18x128xf32, #tpu.memory_space<vmem>>, vector<18x18x128xf32>,
    %11 = vector.shape_cast %8 : vector<256x128xf32> to vector<16x16x128xf32>
    %c1 = arith.constant 1 : index
    %c1_11 = arith.constant 1 : index
    %c0_12 = arith.constant 0 : index
    %12 = vector.load %arg9[%c1, %c1_11, %c0_12] : memref<18x18x128xf32, #tpu.memory_space<vmem>>, vector<16x16x128xf32>
    tpu.vector_store %arg9[%c1, %c1_11, %c0_12], %11 {strides = array<i32>} : memref<18x18x128xf32, #tpu.memory_space<vmem>>, vector<16x16x128xf32>,
    %cst_13 = arith.constant 0.000000e+00 : f32
    %13 = vector.broadcast %cst_13 : f32 to vector<256x128xf32>
    %c0_14 = arith.constant 0 : index
    %c0_15 = arith.constant 0 : index
    %c0_16 = arith.constant 0 : index
    %14 = vector.load %arg9[%c0_14, %c0_15, %c0_16] : memref<18x18x128xf32, #tpu.memory_space<vmem>>, vector<16x16x128xf32>
    %15 = vector.shape_cast %14 : vector<16x16x128xf32> to vector<256x128xf32>
    %c0_17 = arith.constant 0 : index
    %c0_18 = arith.constant 0 : index
    %c0_19 = arith.constant 0 : index
    %16 = vector.load %arg4[%c0_17, %c0_18, %c0_19] : memref<9x128x128xf32, #tpu.memory_space<vmem>>, vector<1x128x128xf32>
    %17 = vector.shape_cast %16 : vector<1x128x128xf32> to vector<128x128xf32>
    %cst_20 = arith.constant dense<0.000000e+00> : vector<256x128xf32>
    %18 = tpu.matmul %15, %17, %cst_20 {dimension_numbers = #tpu.dot_dimension_numbers<[1], [0], [0], [1], [0, 0, 1, 1], [], []>} : vector<256x128xf32>, vector<128x128xf32>, vector<256x128xf32> -> vector<256x128xf32>
    %19 = arith.addf %13, %18 : vector<256x128xf32>
    %c0_21 = arith.constant 0 : index
    %c1_22 = arith.constant 1 : index
    %c0_23 = arith.constant 0 : index
    %20 = vector.load %arg9[%c0_21, %c1_22, %c0_23] : memref<18x18x128xf32, #tpu.memory_space<vmem>>, vector<16x16x128xf32>
    %21 = vector.shape_cast %20 : vector<16x16x128xf32> to vector<256x128xf32>
    %c1_24 = arith.constant 1 : index
    %c0_25 = arith.constant 0 : index
    %c0_26 = arith.constant 0 : index
    %22 = vector.load %arg4[%c1_24, %c0_25, %c0_26] : memref<9x128x128xf32, #tpu.memory_space<vmem>>, vector<1x128x128xf32>
    %23 = vector.shape_cast %22 : vector<1x128x128xf32> to vector<128x128xf32>
    %cst_27 = arith.constant dense<0.000000e+00> : vector<256x128xf32>
    %24 = tpu.matmul %21, %23, %cst_27 {dimension_numbers = #tpu.dot_dimension_numbers<[1], [0], [0], [1], [0, 0, 1, 1], [], []>} : vector<256x128xf32>, vector<128x128xf32>, vector<256x128xf32> -> vector<256x128xf32>
    %25 = arith.addf %19, %24 : vector<256x128xf32>
    %c0_28 = arith.constant 0 : index
    %c2 = arith.constant 2 : index
    %c0_29 = arith.constant 0 : index
    %26 = vector.load %arg9[%c0_28, %c2, %c0_29] : memref<18x18x128xf32, #tpu.memory_space<vmem>>, vector<16x16x128xf32>
    %27 = vector.shape_cast %26 : vector<16x16x128xf32> to vector<256x128xf32>
    %c2_30 = arith.constant 2 : index
    %c0_31 = arith.constant 0 : index
    %c0_32 = arith.constant 0 : index
    %28 = vector.load %arg4[%c2_30, %c0_31, %c0_32] : memref<9x128x128xf32, #tpu.memory_space<vmem>>, vector<1x128x128xf32>
    %29 = vector.shape_cast %28 : vector<1x128x128xf32> to vector<128x128xf32>
    %cst_33 = arith.constant dense<0.000000e+00> : vector<256x128xf32>
    %30 = tpu.matmul %27, %29, %cst_33 {dimension_numbers = #tpu.dot_dimension_numbers<[1], [0], [0], [1], [0, 0, 1, 1], [], []>} : vector<256x128xf32>, vector<128x128xf32>, vector<256x128xf32> -> vector<256x128xf32>
    %31 = arith.addf %25, %30 : vector<256x128xf32>
    %c1_34 = arith.constant 1 : index
    %c0_35 = arith.constant 0 : index
    %c0_36 = arith.constant 0 : index
    %32 = vector.load %arg9[%c1_34, %c0_35, %c0_36] : memref<18x18x128xf32, #tpu.memory_space<vmem>>, vector<16x16x128xf32>
    %33 = vector.shape_cast %32 : vector<16x16x128xf32> to vector<256x128xf32>
    %c3 = arith.constant 3 : index
    %c0_37 = arith.constant 0 : index
    %c0_38 = arith.constant 0 : index
    %34 = vector.load %arg4[%c3, %c0_37, %c0_38] : memref<9x128x128xf32, #tpu.memory_space<vmem>>, vector<1x128x128xf32>
    %35 = vector.shape_cast %34 : vector<1x128x128xf32> to vector<128x128xf32>
    %cst_39 = arith.constant dense<0.000000e+00> : vector<256x128xf32>
    %36 = tpu.matmul %33, %35, %cst_39 {dimension_numbers = #tpu.dot_dimension_numbers<[1], [0], [0], [1], [0, 0, 1, 1], [], []>} : vector<256x128xf32>, vector<128x128xf32>, vector<256x128xf32> -> vector<256x128xf32>
    %37 = arith.addf %31, %36 : vector<256x128xf32>
    %c1_40 = arith.constant 1 : index
    %c1_41 = arith.constant 1 : index
    %c0_42 = arith.constant 0 : index
    %38 = vector.load %arg9[%c1_40, %c1_41, %c0_42] : memref<18x18x128xf32, #tpu.memory_space<vmem>>, vector<16x16x128xf32>
    %39 = vector.shape_cast %38 : vector<16x16x128xf32> to vector<256x128xf32>
    %c4 = arith.constant 4 : index
    %c0_43 = arith.constant 0 : index
    %c0_44 = arith.constant 0 : index
    %40 = vector.load %arg4[%c4, %c0_43, %c0_44] : memref<9x128x128xf32, #tpu.memory_space<vmem>>, vector<1x128x128xf32>
    %41 = vector.shape_cast %40 : vector<1x128x128xf32> to vector<128x128xf32>
    %cst_45 = arith.constant dense<0.000000e+00> : vector<256x128xf32>
    %42 = tpu.matmul %39, %41, %cst_45 {dimension_numbers = #tpu.dot_dimension_numbers<[1], [0], [0], [1], [0, 0, 1, 1], [], []>} : vector<256x128xf32>, vector<128x128xf32>, vector<256x128xf32> -> vector<256x128xf32>
    %43 = arith.addf %37, %42 : vector<256x128xf32>
    %c1_46 = arith.constant 1 : index
    %c2_47 = arith.constant 2 : index
    %c0_48 = arith.constant 0 : index
    %44 = vector.load %arg9[%c1_46, %c2_47, %c0_48] : memref<18x18x128xf32, #tpu.memory_space<vmem>>, vector<16x16x128xf32>
    %45 = vector.shape_cast %44 : vector<16x16x128xf32> to vector<256x128xf32>
    %c5 = arith.constant 5 : index
    %c0_49 = arith.constant 0 : index
    %c0_50 = arith.constant 0 : index
    %46 = vector.load %arg4[%c5, %c0_49, %c0_50] : memref<9x128x128xf32, #tpu.memory_space<vmem>>, vector<1x128x128xf32>
    %47 = vector.shape_cast %46 : vector<1x128x128xf32> to vector<128x128xf32>
    %cst_51 = arith.constant dense<0.000000e+00> : vector<256x128xf32>
    %48 = tpu.matmul %45, %47, %cst_51 {dimension_numbers = #tpu.dot_dimension_numbers<[1], [0], [0], [1], [0, 0, 1, 1], [], []>} : vector<256x128xf32>, vector<128x128xf32>, vector<256x128xf32> -> vector<256x128xf32>
    %49 = arith.addf %43, %48 : vector<256x128xf32>
    %c2_52 = arith.constant 2 : index
    %c0_53 = arith.constant 0 : index
    %c0_54 = arith.constant 0 : index
    %50 = vector.load %arg9[%c2_52, %c0_53, %c0_54] : memref<18x18x128xf32, #tpu.memory_space<vmem>>, vector<16x16x128xf32>
    %51 = vector.shape_cast %50 : vector<16x16x128xf32> to vector<256x128xf32>
    %c6 = arith.constant 6 : index
    %c0_55 = arith.constant 0 : index
    %c0_56 = arith.constant 0 : index
    %52 = vector.load %arg4[%c6, %c0_55, %c0_56] : memref<9x128x128xf32, #tpu.memory_space<vmem>>, vector<1x128x128xf32>
    %53 = vector.shape_cast %52 : vector<1x128x128xf32> to vector<128x128xf32>
    %cst_57 = arith.constant dense<0.000000e+00> : vector<256x128xf32>
    %54 = tpu.matmul %51, %53, %cst_57 {dimension_numbers = #tpu.dot_dimension_numbers<[1], [0], [0], [1], [0, 0, 1, 1], [], []>} : vector<256x128xf32>, vector<128x128xf32>, vector<256x128xf32> -> vector<256x128xf32>
    %55 = arith.addf %49, %54 : vector<256x128xf32>
    %c2_58 = arith.constant 2 : index
    %c1_59 = arith.constant 1 : index
    %c0_60 = arith.constant 0 : index
    %56 = vector.load %arg9[%c2_58, %c1_59, %c0_60] : memref<18x18x128xf32, #tpu.memory_space<vmem>>, vector<16x16x128xf32>
    %57 = vector.shape_cast %56 : vector<16x16x128xf32> to vector<256x128xf32>
    %c7 = arith.constant 7 : index
    %c0_61 = arith.constant 0 : index
    %c0_62 = arith.constant 0 : index
    %58 = vector.load %arg4[%c7, %c0_61, %c0_62] : memref<9x128x128xf32, #tpu.memory_space<vmem>>, vector<1x128x128xf32>
    %59 = vector.shape_cast %58 : vector<1x128x128xf32> to vector<128x128xf32>
    %cst_63 = arith.constant dense<0.000000e+00> : vector<256x128xf32>
    %60 = tpu.matmul %57, %59, %cst_63 {dimension_numbers = #tpu.dot_dimension_numbers<[1], [0], [0], [1], [0, 0, 1, 1], [], []>} : vector<256x128xf32>, vector<128x128xf32>, vector<256x128xf32> -> vector<256x128xf32>
    %61 = arith.addf %55, %60 : vector<256x128xf32>
    %c2_64 = arith.constant 2 : index
    %c2_65 = arith.constant 2 : index
    %c0_66 = arith.constant 0 : index
    %62 = vector.load %arg9[%c2_64, %c2_65, %c0_66] : memref<18x18x128xf32, #tpu.memory_space<vmem>>, vector<16x16x128xf32>
    %63 = vector.shape_cast %62 : vector<16x16x128xf32> to vector<256x128xf32>
    %c8 = arith.constant 8 : index
    %c0_67 = arith.constant 0 : index
    %c0_68 = arith.constant 0 : index
    %64 = vector.load %arg4[%c8, %c0_67, %c0_68] : memref<9x128x128xf32, #tpu.memory_space<vmem>>, vector<1x128x128xf32>
    %65 = vector.shape_cast %64 : vector<1x128x128xf32> to vector<128x128xf32>
    %cst_69 = arith.constant dense<0.000000e+00> : vector<256x128xf32>
    %66 = tpu.matmul %63, %65, %cst_69 {dimension_numbers = #tpu.dot_dimension_numbers<[1], [0], [0], [1], [0, 0, 1, 1], [], []>} : vector<256x128xf32>, vector<128x128xf32>, vector<256x128xf32> -> vector<256x128xf32>
    %67 = arith.addf %61, %66 : vector<256x128xf32>
    %c0_70 = arith.constant 0 : index
    %c0_71 = arith.constant 0 : index
    %68 = vector.load %arg5[%c0_70, %c0_71] : memref<1x128xf32, #tpu.memory_space<vmem>>, vector<1x128xf32>
    %69 = vector.broadcast %68 : vector<1x128xf32> to vector<256x128xf32>
    %70 = arith.addf %67, %69 : vector<256x128xf32>
    %cst_72 = arith.constant 0.000000e+00 : f32
    %71 = vector.broadcast %cst_72 : f32 to vector<256x128xf32>
    %72 = arith.maximumf %70, %71 : vector<256x128xf32>
    %c0_73 = arith.constant 0 : index
    %c0_74 = arith.constant 0 : index
    %73 = vector.load %arg6[%c0_73, %c0_74] : memref<128x128xf32, #tpu.memory_space<vmem>>, vector<128x128xf32>
    %cst_75 = arith.constant dense<0.000000e+00> : vector<256x128xf32>
    %74 = tpu.matmul %72, %73, %cst_75 {dimension_numbers = #tpu.dot_dimension_numbers<[1], [0], [0], [1], [0, 0, 1, 1], [], []>} : vector<256x128xf32>, vector<128x128xf32>, vector<256x128xf32> -> vector<256x128xf32>
    %c0_76 = arith.constant 0 : index
    %c0_77 = arith.constant 0 : index
    %75 = vector.load %arg7[%c0_76, %c0_77] : memref<1x128xf32, #tpu.memory_space<vmem>>, vector<1x128xf32>
    %76 = vector.broadcast %75 : vector<1x128xf32> to vector<256x128xf32>
    %77 = arith.addf %74, %76 : vector<256x128xf32>
    %78 = arith.addf %77, %1 : vector<256x128xf32>
    %cst_78 = arith.constant 0.000000e+00 : f32
    %79 = vector.broadcast %cst_78 : f32 to vector<256x128xf32>
    %80 = arith.maximumf %78, %79 : vector<256x128xf32>
    %c0_79 = arith.constant 0 : index
    %c0_80 = arith.constant 0 : index
    %c0_81 = arith.constant 0 : index
    %81 = vector.load %arg8[%c0_79, %c0_80, %c0_81] : memref<1x256x128xf32, #tpu.memory_space<vmem>>, vector<1x256x128xf32>
    %82 = vector.shape_cast %81 : vector<1x256x128xf32> to vector<256x128xf32>
    %83 = vector.shape_cast %80 : vector<256x128xf32> to vector<1x256x128xf32>
    tpu.vector_store %arg8[%c0_79, %c0_80, %c0_81], %83 {strides = array<i32>} : memref<1x256x128xf32, #tpu.memory_space<vmem>>, vector<1x256x128xf32>,
    return
  }
  func.func @transform_0(%arg0: i32) -> (i32, i32, i32) {
    %c0_i32 = arith.constant 0 : i32
    %c0_i32_0 = arith.constant 0 : i32
    %c0_i32_1 = arith.constant 0 : i32
    return %arg0, %c0_i32, %c0_i32_0 : i32, i32, i32
  }
  func.func @transform_1(%arg0: i32) -> (i32, i32) {
    %c0_i32 = arith.constant 0 : i32
    %c0_i32_0 = arith.constant 0 : i32
    %c0_i32_1 = arith.constant 0 : i32
    return %c0_i32, %c0_i32_0 : i32, i32
  }
  func.func @transform_2(%arg0: i32) -> (i32, i32) {
    %c0_i32 = arith.constant 0 : i32
    %c0_i32_0 = arith.constant 0 : i32
    %c0_i32_1 = arith.constant 0 : i32
    return %c0_i32, %c0_i32_0 : i32, i32
  }
  func.func @transform_3(%arg0: i32) -> (i32, i32, i32) {
    %c0_i32 = arith.constant 0 : i32
    %c0_i32_0 = arith.constant 0 : i32
    %c0_i32_1 = arith.constant 0 : i32
    %c0_i32_2 = arith.constant 0 : i32
    return %c0_i32, %c0_i32_0, %c0_i32_1 : i32, i32, i32
  }
  func.func @transform_4(%arg0: i32) -> (i32, i32) {
    %c0_i32 = arith.constant 0 : i32
    %c0_i32_0 = arith.constant 0 : i32
    %c0_i32_1 = arith.constant 0 : i32
    return %c0_i32, %c0_i32_0 : i32, i32
  }
  func.func @transform_5(%arg0: i32) -> (i32, i32) {
    %c0_i32 = arith.constant 0 : i32
    %c0_i32_0 = arith.constant 0 : i32
    %c0_i32_1 = arith.constant 0 : i32
    return %c0_i32, %c0_i32_0 : i32, i32
  }
  func.func @transform_6(%arg0: i32) -> (i32, i32) {
    %c0_i32 = arith.constant 0 : i32
    %c0_i32_0 = arith.constant 0 : i32
    %c0_i32_1 = arith.constant 0 : i32
    return %c0_i32, %c0_i32_0 : i32, i32
  }
  func.func @transform_7(%arg0: i32) -> (i32, i32, i32) {
    %c0_i32 = arith.constant 0 : i32
    %c0_i32_0 = arith.constant 0 : i32
    %c0_i32_1 = arith.constant 0 : i32
    return %arg0, %c0_i32, %c0_i32_0 : i32, i32, i32
  }
}

</mosaic_0001>

<bundles_post_ra>
// kernel: tpu_custom_call.1
= control target key start
LH: loop header
LB: loop body
LE: loop exit
PB: predicated region body
PF: predicated region fallthrough
CT: control target
= control target key end

     0   :  { %12 = vsyncpa [#allocation4], 0  ;;  %s7475_s0 = inlined_call_operand.hbm [shape: f32[2,256,128], index: 0, kind: input, shape index: {}]   ;;  %s7476_s1 = inlined_call_operand.hbm [shape: f32[128,128], index: 1, kind: input, shape index: {}]   ;;  %s7477_s2 = inlined_call_operand.vmem [shape: f32[1,128], index: 2, kind: input, shape index: {}]   ;;  %s7478_s3 = inlined_call_operand.hbm [shape: f32[9,128,128], index: 3, kind: input, shape index: {}]   ;;  %s7479_s4 = inlined_call_operand.vmem [shape: f32[1,128], index: 4, kind: input, shape index: {}]   ;;  %s7480_s5 = inlined_call_operand.hbm [shape: f32[128,128], index: 5, kind: input, shape index: {}]   ;;  %s7481_s6 = inlined_call_operand.vmem [shape: f32[1,128], index: 6, kind: input, shape index: {}]   ;;  %s7482_s7 = inlined_call_operand.hbm [shape: f32[2,256,128], index: 7, kind: output, shape index: {}]  }
   0x1   :  { %14 = vsyncpa [#allocation4 + $0x1], 0 }
   0x2   :  { %15 = vsyncpa [#allocation7], 0 }
   0x3   :  { %16 = vsyncpa [#allocation10], 0 }
   0x4   :  { %17 = vsyncpa [#allocation5], 0 }
   0x5   :  { %19 = vsyncpa [#allocation5 + $0x1], 0  ;;  %s6373_s24 = smov 0   ;;  %s6375_s25 = smov 0  }
   0x6   :  { %s6377_s26 = smov 0   ;;  %s6379_s27 = smov 0  }
   0x7 LB: > { %s6394_s28 = sadd.s32 4294967295, %s6321_s27   ;;  %s3961_s29 = sadd.s32 4294967294, %s6321_s27   ;;  %s6321_s27 = sphi %s6379_s27, %s7550_s27   ;;  %s6317_s26 = sphi %s6377_s26, %s7549_s26   ;;  %s6313_s25 = sphi %s6375_s25, %s7548_s25   ;;  %s6309_s24 = sphi %s6373_s24, %s7547_s24  }
   0x8   : > { %p45_p0 = scmp.ne.s32.totalorder %s6313_s25, %s6309_s24  ;;  %p7483_p1 = scmp.eq.s32.totalorder %s6394_s28, 0 }
   0x9   : > { %p201_p3 = scmp.eq.s32.totalorder %s3961_s29, 1  ;;  %p3962_p5 = scmp.ge.s32.totalorder %s6321_s27, 1 }
   0xa   : > { %p6403_p4 = por %p7483_p1, %p45_p0  ;;  %p208_p7 = scmp.lt.s32.totalorder %s6321_s27, 3 }
   0xb   : > { %p6408_p6 = por %p201_p3, %p45_p0  ;;  %s6323_s10 = smov [#allocation6]  }
   0xc   : > { %s7507_s30 = scalar_select %p6403_p4, 1, 0 }
   0xd   : > { %s7508_s8 = scalar_select %p6408_p6, 1, 0 }
   0xe   : > { %p6413_p8 = pnand %p3962_p5, %p208_p7  ;;  %s220_s11 = sshll.u32 %s6323_s10, 4  ;;  %s6417_s11 = int_to_ptr.vmem [resolvable:$true] %s220_s11 }
   0xf   : > { %7509 = sst [smem:[#allocation16_spill]] %s7508_s8  ;;  %s6324_s13 = smov [#allocation8]  }
  0x10   : > { %s7510_s9 = scalar_select %p6413_p8, 1, 0 }
  0x11   : > { %p6034_p9 = pneg %p6413_p8  ;;  %s236_s14 = sshll.u32 %s6324_s13, 4  ;;  %s6428_s14 = int_to_ptr.vmem [resolvable:$true] %s236_s14 }
  0x12   : > { %s6325_s15 = smov [#allocation9]   ;;  %s6133_s19 = scalar_lea.hbm %s7476_s1, 2048 }
  0x13   : > { %p6424_p11 = pnand %p6034_p9, %p7483_p1  ;;  %s6430_s16 = sshll.u32 %s6325_s15, 4  ;;  %s253_s16 = int_to_ptr.vmem [resolvable:$true] %s6430_s16 }
  0x14   : > { %p6134_p12 = scmp.ne.s32.totalorder %s7476_s1, %s6133_s19  ;;  %p6140_p5 = scmp.lt.u32.totalorder %s6133_s19, %s7476_s1 }
  0x15   : > { %p6440_p13 = pneg %p6424_p11 }
  0x17   : > { %p6136_p0 = pnand %p6440_p13, %p6134_p12 }
  0x19   : > { %p6137_p3 = pneg %p6136_p0 }
  0x1b   : > { %p6142_p7 = pnand %p6140_p5, %p6137_p3 }
  0x1d   : > { %6145 = shalt.err (!%p6142_p7)
}
  0x1e   : > { %s6146_s10 = scalar_lea.vmem %s6417_s11, 2048  ;;  %p6154_p2 = scmp.lt.s32.totalorder %s6417_s11, %s6417_s11 }
  0x1f   : > { %p6147_p9 = scmp.ne.s32.totalorder %s6417_s11, %s6146_s10  ;;  %p6155_p6 = scmp.lt.s32.totalorder %s6146_s10, %s6146_s10 }
  0x21   : > { %p6149_p10 = pnand %p6147_p9, %p6440_p13  ;;  %p6156_p12 = por %p6155_p6, %p6154_p2 }
  0x23   : > { %p6150_p1 = pneg %p6149_p10 }
  0x25   : > { %p6157_p0 = pnand %p6156_p12, %p6150_p1 }
  0x27   : > { %6160 = shalt.err (!%p6157_p0)
}
  0x28   : > { %s6326_s13 = smov 128   ;;  %s6327_s15 = smov 8  }
  0x29   : > { %6037 = dma.hbm_to_vmem [thread:$0]  (!%p6424_p11), %s7476_s1, 2048, %s6417_s11, [#allocation7], %s6326_s13, %s6326_s13, %s6327_s15  }
  0x2a   : > { %s6161_s21 = scalar_lea.hbm %s7478_s3, 18432 }
  0x2b   : > { %p6162_p1 = scmp.ne.s32.totalorder %s7478_s3, %s6161_s21  ;;  %p6168_p10 = scmp.lt.u32.totalorder %s6161_s21, %s7478_s3 }
  0x2d   : > { %p6164_p2 = pnand %p6162_p1, %p6440_p13 }
  0x2f   : > { %p6165_p6 = pneg %p6164_p2 }
  0x31   : > { %p6170_p3 = pnand %p6168_p10, %p6165_p6 }
  0x33   : > { %6173 = shalt.err (!%p6170_p3)
}
  0x34   : > { %s6174_s11 = scalar_lea.vmem %s6428_s14, 18432  ;;  %p6182_p12 = scmp.lt.s32.totalorder %s6428_s14, %s6428_s14 }
  0x35   : > { %p6175_p5 = scmp.ne.s32.totalorder %s6428_s14, %s6174_s11  ;;  %p6183_p0 = scmp.lt.s32.totalorder %s6174_s11, %s6174_s11 }
  0x37   : > { %p6177_p7 = pnand %p6175_p5, %p6440_p13  ;;  %p6184_p1 = por %p6183_p0, %p6182_p12 }
  0x39   : > { %p6178_p9 = pneg %p6177_p7 }
  0x3b   : > { %p6185_p2 = pnand %p6184_p1, %p6178_p9 }
  0x3d   : > { %6188 = shalt.err (!%p6185_p2)
}
  0x3e   : > { %6040 = dma.hbm_to_vmem [thread:$0]  (!%p6424_p11), %s7478_s3, 18432, %s6428_s14, [#allocation7], %s6326_s13, %s6326_s13, %s6327_s15  }
  0x3f   : > { %s6189_s20 = scalar_lea.hbm %s7480_s5, 2048 }
  0x40   : > { %p6190_p6 = scmp.ne.s32.totalorder %s7480_s5, %s6189_s20  ;;  %p6196_p5 = scmp.lt.u32.totalorder %s6189_s20, %s7480_s5 }
  0x42   : > { %p6192_p10 = pnand %p6190_p6, %p6440_p13 }
  0x44   : > { %p6193_p3 = pneg %p6192_p10 }
  0x46   : > { %p6198_p7 = pnand %p6196_p5, %p6193_p3 }
  0x48   : > { %6201 = shalt.err (!%p6198_p7)
}
  0x49   : > { %s6202_s11 = scalar_lea.vmem %s253_s16, 2048  ;;  %p6210_p1 = scmp.lt.s32.totalorder %s253_s16, %s253_s16 }
  0x4a   : > { %p6203_p9 = scmp.ne.s32.totalorder %s253_s16, %s6202_s11  ;;  %p6211_p2 = scmp.lt.s32.totalorder %s6202_s11, %s6202_s11 }
  0x4c   : > { %p6205_p12 = pnand %p6203_p9, %p6440_p13  ;;  %p6212_p4 = por %p6211_p2, %p6210_p1 }
  0x4e   : > { %p6206_p0 = pneg %p6205_p12 }
  0x50   : > { %p6213_p8 = pnand %p6212_p4, %p6206_p0 }
  0x52   : > { %6216 = shalt.err (!%p6213_p8)
}
  0x53   : > { %6043 = dma.hbm_to_vmem [thread:$0]  (!%p6424_p11), %s7480_s5, 2048, %s253_s16, [#allocation10], %s6326_s13, %s6326_s13, %s6327_s15  }
  0x54   : > { %s6513_s22 = sadd.s32 1, %s6321_s27   ;;  %s32_s17 = sadd.s32 1, %s6317_s26 }
  0x55   : > { %s29_s12 = ssub.s32 %s6321_s27, %s6513_s22  ;;  %p39_p8 = scmp.ne.s32.totalorder %s6317_s26, %s6313_s25 }
  0x56   : > { %p30_p4 = scmp.eq.s32.totalorder %s29_s12, 0  ;;  %p40_p13 = scmp.eq.s32.totalorder %s6321_s27, 0 }
  0x57   : > { %p6055_p6 = scmp.lt.s32.totalorder %s6321_s27, 2  ;;  %p7513_p3 = scmp.eq.s32.totalorder %s6394_s28, 1 }
  0x58   : > { %s6523_s18 = scalar_select %p30_p4, %s6317_s26, %s32_s17  }
  0x59   : > { %p41_p10 = por %p40_p13, %p39_p8  ;;  %p6527_p5 = por %p7513_p3, %p39_p8 }
  0x5a   : > { %s269_s20 = sand.u32 1, %s6317_s26   ;;  %s3984_s21 = sshll.u32 %s6321_s27, 12 }
  0x5b   : > { %s3967_s16 = sshll.u32 %s269_s20, 8  ;;  %s6536_s10 = scalar_lea.hbm %s7475_s0, %s3984_s21 }
  0x5c   : > { %s273_s11 = scalar_lea.vmem [#allocation3], %s3967_s16  ;;  %p6538_p11 = pnand %p6055_p6, %p41_p10 }
  0x5d   : > { %s280_s14 = sshll.u32 %s273_s11, 4  ;;  %s6544_s12 = scalar_lea.sflag [#allocation4], %s269_s20  ;;  %s6542_s14 = int_to_ptr.vmem [resolvable:$true] %s280_s14 }
  0x5e   : > { %s6217_s17 = scalar_lea.hbm %s6536_s10, 4096  ;;  %p6219_p9 = pneg %p6538_p11 }
  0x5f   : > { %p6218_p7 = scmp.ne.s32.totalorder %s6536_s10, %s6217_s17  ;;  %s6222_s23 = scalar_lea.hbm %s7475_s0, 8192 }
  0x60   : > { %p6223_p1 = scmp.lt.u32.totalorder %s6536_s10, %s7475_s0  ;;  %p6224_p2 = scmp.lt.u32.totalorder %s6222_s23, %s6217_s17 }
  0x61   : > { %p6220_p12 = pnand %p6219_p9, %p6218_p7  ;;  %p6226_p8 = scmp.lt.u32.totalorder %s6217_s17, %s6536_s10 }
  0x62   : > { %p6225_p4 = por %p6224_p2, %p6223_p1 }
  0x63   : > { %p6221_p0 = pneg %p6220_p12 }
  0x64   : > { %p6227_p13 = por %p6226_p8, %p6225_p4 }
  0x66   : > { %p6228_p6 = pnand %p6227_p13, %p6221_p0 }
  0x68   : > { %6231 = shalt.err (!%p6228_p6)
}
  0x69   : > { %s6232_s20 = scalar_lea.vmem %s6542_s14, 4096  ;;  %s6328_s21 = smov [#allocation3]  }
  0x6a   : > { %p6233_p10 = scmp.ne.s32.totalorder %s6542_s14, %s6232_s20  ;;  %s6237_s16 = sshll.u32 %s6328_s21, 4  ;;  %s6238_s16 = int_to_ptr.vmem [resolvable:$false] %s6237_s16 }
  0x6b   : > { %s6239_s29 = scalar_lea.vmem %s6238_s16, 8192  ;;  %p6240_p12 = scmp.lt.s32.totalorder %s6542_s14, %s6238_s16 }
  0x6c   : > { %p6235_p3 = pnand %p6233_p10, %p6219_p9  ;;  %p6241_p1 = scmp.lt.s32.totalorder %s6239_s29, %s6232_s20 }
  0x6e   : > { %p6236_p7 = pneg %p6235_p3  ;;  %p6242_p2 = por %p6241_p1, %p6240_p12 }
  0x70   : > { %p6243_p4 = pnand %p6242_p2, %p6236_p7 }
  0x72   : > { %6246 = shalt.err (!%p6243_p4)
}
  0x73   : > { %6047 = dma.hbm_to_vmem [thread:$0]  (!%p6538_p11), %s6536_s10, 4096, %s6542_s14, %s6544_s12, %s6326_s13, %s6326_s13, %s6327_s15  }
  0x74   : > { %p7516_p9 = scmp.ne.s32.totalorder %s7510_s9, 0 }
  0x76   : > { %292 = sbr.rel (%p7516_p9) target bundleno = 1231 (0x4cf), region = 48 }
  0x7d   : > { %s6578_s17 = sand.u32 1, %s6313_s25   ;;  %p7517_p0 = scmp.ne.s32.totalorder %s7507_s30, 0 }
  0x7e   : > { %s3971_s23 = sshll.u32 %s6578_s17, 8  ;;  %s295_s11 = scalar_lea.sflag [#allocation4], %s6578_s17 }
  0x7f   : > { %s6584_s8 = scalar_lea.vmem [#allocation3], %s3971_s23 }
  0x80   : > { %6292 = dma.done.wait (%p7517_p0), %s295_s11, 4096  }
  0x81   : > { %6294 = vsyncadd (%p7517_p0), %s295_s11, 4294963200  ;;  %p7518_p11 = scmp.eq.s32.totalorder %s6394_s28, 0 }
  0x83   : > { %6296 = dma.done.wait (%p7518_p11), [#allocation7], 20480   ;;  %p7519_p8 = pmov %p7518_p11 }
  0x85   : > { %6298 = vsyncadd (%p7519_p8), [#allocation7], 4294946816  ;;  %p7520_p13 = pmov %p7519_p8 }
  0x86   : > { %p7521_p6 = pmov %p7519_p8 }
  0x87   : > { %6300 = dma.done.wait (%p7520_p13), [#allocation10], 2048  }
  0x88   : > { %6302 = vsyncadd (%p7521_p6), [#allocation10], 4294965248  ;;  %v373_v0 = vld [vmem:[#allocation6] sm:$0xff]  ;;  %v374_v1 = vld [vmem:[#allocation6 + $0x8] sm:$0xff]  ;;  %s7332_s12 = scalar_lea.vmem [#allocation11], %s3971_s23  ;;  %s3985_s20 = sshll.u32 %s6394_s28, 12 }
  0x89   : > { %v375_v2 = vld [vmem:[#allocation6 + $0x10] sm:$0xff]  ;;  %v5394_v3 = vpack.c.bf16 %v374_v1, %v373_v0  ;;  %v376_v4 = vld [vmem:[#allocation6 + $0x18] sm:$0xff]  ;;  %v377_v6 = vld [vmem:[#allocation6 + $0x20] sm:$0xff]  ;;  %s3859_s21 = sshll.u32 %s7332_s12, 4  ;;  %s7427_s23 = scalar_lea.hbm %s7482_s7, %s3985_s20  ;;  %s7429_s21 = int_to_ptr.vmem [resolvable:$true] %s3859_s21 }
  0x8a   : > { %v5398_v5 = vpack.c.bf16 %v376_v4, %v375_v2  ;;  %v378_v7 = vld [vmem:[#allocation6 + $0x28] sm:$0xff]  ;;  %v341_v9 = vld [vmem:[%s6584_s8] sm:$0xff]  ;;  %v379_v10 = vld [vmem:[#allocation6 + $0x30] sm:$0xff]  ;;  %s3846_s28 = scalar_lea.sflag [#allocation5], %s6578_s17  ;;  %s6247_s11 = scalar_lea.vmem %s7429_s21, 4096 }
  0x8b   : > { %5395 = vmatprep.subr.bf16.mxu0 %v5394_v3  ;;  %v5402_v8 = vpack.c.bf16 %v378_v7, %v377_v6  ;;  %v380_v11 = vld [vmem:[#allocation6 + $0x38] sm:$0xff]  ;;  %4546 = vmatprep.mubr.f32.mxu0 %v341_v9  ;;  %v381_v13 = vld [vmem:[#allocation6 + $0x40] sm:$0xff]  ;;  %v382_v14 = vld [vmem:[#allocation6 + $0x48] sm:$0xff]  ;;  %p6248_p10 = scmp.ne.s32.totalorder %s7429_s21, %s6247_s11 }
  0x8c   : > { %5397 = vmatpush3.bf16.msra.mxu0 %v5394_v3  ;;  %v5406_v12 = vpack.c.bf16 %v380_v11, %v379_v10  ;;  %v5410_v15 = vpack.c.bf16 %v382_v14, %v381_v13  ;;  %v383_v16 = vld [vmem:[#allocation6 + $0x50] sm:$0xff]  ;;  %v384_v17 = vld [vmem:[#allocation6 + $0x58] sm:$0xff]  ;;  %v385_v19 = vld [vmem:[#allocation6 + $0x60] sm:$0xff]  ;;  %v6329_v13 = vmov 0.0  }
  0x8d   : > { %5399 = vmatprep.subr.bf16.mxu0 %v5398_v5  ;;  %v5414_v18 = vpack.c.bf16 %v384_v17, %v383_v16  ;;  %v386_v20 = vld [vmem:[#allocation6 + $0x68] sm:$0xff]  ;;  %v387_v22 = vld [vmem:[#allocation6 + $0x70] sm:$0xff]  ;;  %v388_v23 = vld [vmem:[#allocation6 + $0x78] sm:$0xff]  ;;  %657 = vst [vmem:[#allocation2 + $0x20] sm:$0xff] %v6329_v13  ;;  %p6249_p3 = pnand %p6248_p10, %p6527_p5 }
  0x8e   : > { %v5418_v21 = vpack.c.bf16 %v386_v20, %v385_v19  ;;  %v5422_v24 = vpack.c.bf16 %v388_v23, %v387_v22  ;;  %v821_v25 = vld [vmem:[#allocation8 + $0x80] sm:$0xff]  ;;  %v822_v26 = vld [vmem:[#allocation8 + $0x88] sm:$0xff]  ;;  %v823_v28 = vld [vmem:[#allocation8 + $0x90] sm:$0xff]  ;;  %658 = vst [vmem:[#allocation2 + $0x28] sm:$0x3] %v6329_v13 }
  0x8f   : > { %v5426_v27 = vpack.c.bf16 %v822_v26, %v821_v25  ;;  %v824_v29 = vld [vmem:[#allocation8 + $0x98] sm:$0xff]  ;;  %v342_v30 = vld [vmem:[%s6584_s8 + $0x8] sm:$0xff]  ;;  %v343_v31 = vld [vmem:[%s6584_s8 + $0x10] sm:$0xff]  ;;  %653 = vst [vmem:[#allocation2] sm:$0xff] %v6329_v13  ;;  %p6250_p7 = pneg %p6249_p3 }
  0x90   : > { %5401 = vmatpush3.bf16.msra.mxu0 %v5398_v5  ;;  %v5430_v32 = vpack.c.bf16 %v824_v29, %v823_v28  ;;  %v825_v33 = vld [vmem:[#allocation8 + $0xa0] sm:$0xff]  ;;  %v826_v34 = vld [vmem:[#allocation8 + $0xa8] sm:$0xff]  ;;  %v344_v35 = vld [vmem:[%s6584_s8 + $0x18] sm:$0xff]  ;;  %654 = vst [vmem:[#allocation2 + $0x8] sm:$0xff] %v6329_v13 }
  0x91   : > { %5403 = vmatprep.subr.bf16.mxu0 %v5402_v8  ;;  %v345_v36 = vld [vmem:[%s6584_s8 + $0x20] sm:$0xff]  ;;  %v5434_v37 = vpack.c.bf16 %v826_v34, %v825_v33  ;;  %v827_v38 = vld [vmem:[#allocation8 + $0xb0] sm:$0xff]  ;;  %v828_v39 = vld [vmem:[#allocation8 + $0xb8] sm:$0xff]  ;;  %655 = vst [vmem:[#allocation2 + $0x10] sm:$0x3] %v6329_v13 }
  0x92   : > { %v346_v40 = vld [vmem:[%s6584_s8 + $0x28] sm:$0xff]  ;;  %v347_v41 = vld [vmem:[%s6584_s8 + $0x30] sm:$0xff]  ;;  %v5438_v42 = vpack.c.bf16 %v828_v39, %v827_v38  ;;  %v829_v43 = vld [vmem:[#allocation8 + $0xc0] sm:$0xff]  ;;  %656 = vst [vmem:[#allocation2 + $0x18] sm:$0xff] %v6329_v13 }
  0x93   : > { %v830_v44 = vld [vmem:[#allocation8 + $0xc8] sm:$0xff]  ;;  %v348_v45 = vld [vmem:[%s6584_s8 + $0x38] sm:$0xff]  ;;  %v349_v46 = vld [vmem:[%s6584_s8 + $0x40] sm:$0xff]  ;;  %659 = vst [vmem:[#allocation2 + $0x30] sm:$0xff] %v6329_v13 }
  0x94   : > { %5405 = vmatpush3.bf16.msra.mxu0 %v5402_v8  ;;  %v5442_v47 = vpack.c.bf16 %v830_v44, %v829_v43  ;;  %v831_v48 = vld [vmem:[#allocation8 + $0xd0] sm:$0xff]  ;;  %v832_v49 = vld [vmem:[#allocation8 + $0xd8] sm:$0xff]  ;;  %v350_v50 = vld [vmem:[%s6584_s8 + $0x48] sm:$0xff]  ;;  %660 = vst [vmem:[#allocation2 + $0x38] sm:$0xff] %v6329_v13 }
  0x95   : > { %5407 = vmatprep.subr.bf16.mxu0 %v5406_v12  ;;  %v351_v51 = vld [vmem:[%s6584_s8 + $0x50] sm:$0xff]  ;;  %v5446_v52 = vpack.c.bf16 %v832_v49, %v831_v48  ;;  %v352_v53 = vld [vmem:[%s6584_s8 + $0x58] sm:$0xff]  ;;  %v353_v54 = vld [vmem:[%s6584_s8 + $0x60] sm:$0xff]  ;;  %661 = vst [vmem:[#allocation2 + $0x40] sm:$0x3] %v6329_v13 }
  0x96   : > { %v354_v55 = vld [vmem:[%s6584_s8 + $0x68] sm:$0xff]  ;;  %v355_v56 = vld [vmem:[%s6584_s8 + $0x70] sm:$0xff]  ;;  %v356_v57 = vld [vmem:[%s6584_s8 + $0x78] sm:$0xff]  ;;  %662 = vst [vmem:[#allocation2 + $0x48] sm:$0xff] %v6329_v13 }
  0x97   : > { %v357_v58 = vld [vmem:[%s6584_s8 + $0x80] sm:$0xff]  ;;  %v358_v59 = vld [vmem:[%s6584_s8 + $0x88] sm:$0xff]  ;;  %v359_v60 = vld [vmem:[%s6584_s8 + $0x90] sm:$0xff]  ;;  %663 = vst [vmem:[#allocation2 + $0x50] sm:$0xff] %v6329_v13 }
  0x98   : > { %5409 = vmatpush3.bf16.msra.mxu0 %v5406_v12  ;;  %v360_v61 = vld [vmem:[%s6584_s8 + $0x98] sm:$0xff]  ;;  %v361_v62 = vld [vmem:[%s6584_s8 + $0xa0] sm:$0xff]  ;;  %v362_v63 = vld [vmem:[%s6584_s8 + $0xa8] sm:$0xff]  ;;  %664 = vst [vmem:[#allocation2 + $0x58] sm:$0x3] %v6329_v13 }
  0x99   : > { %5411 = vmatprep.subr.bf16.mxu0 %v5410_v15  ;;  %v363_v0 = vld [vmem:[%s6584_s8 + $0xb0] sm:$0xff]  ;;  %v364_v1 = vld [vmem:[%s6584_s8 + $0xb8] sm:$0xff]  ;;  %v365_v2 = vld [vmem:[%s6584_s8 + $0xc0] sm:$0xff]  ;;  %665 = vst [vmem:[#allocation2 + $0x60] sm:$0xff] %v6329_v13 }
  0x9a   : > { %v366_v3 = vld [vmem:[%s6584_s8 + $0xc8] sm:$0xff]  ;;  %v367_v4 = vld [vmem:[%s6584_s8 + $0xd0] sm:$0xff]  ;;  %v368_v5 = vld [vmem:[%s6584_s8 + $0xd8] sm:$0xff]  ;;  %666 = vst [vmem:[#allocation2 + $0x68] sm:$0xff] %v6329_v13 }
  0x9b   : > { %v369_v6 = vld [vmem:[%s6584_s8 + $0xe0] sm:$0xff]  ;;  %v370_v7 = vld [vmem:[%s6584_s8 + $0xe8] sm:$0xff]  ;;  %v371_v8 = vld [vmem:[%s6584_s8 + $0xf0] sm:$0xff]  ;;  %667 = vst [vmem:[#allocation2 + $0x70] sm:$0x3] %v6329_v13 }
  0x9c   : > { %5413 = vmatpush3.bf16.msra.mxu0 %v5410_v15  ;;  %v372_v9 = vld [vmem:[%s6584_s8 + $0xf8] sm:$0xff]  ;;  %v833_v10 = vld [vmem:[#allocation8 + $0xe0] sm:$0xff]  ;;  %v834_v11 = vld [vmem:[#allocation8 + $0xe8] sm:$0xff]  ;;  %668 = vst [vmem:[#allocation2 + $0x78] sm:$0xff] %v6329_v13 }
  0x9d   : > { %5415 = vmatprep.subr.bf16.mxu0 %v5414_v18  ;;  %v5450_v12 = vpack.c.bf16 %v834_v11, %v833_v10  ;;  %669 = vst [vmem:[#allocation2 + $0x80] sm:$0xff] %v6329_v13  ;;  %670 = vst [vmem:[#allocation2 + $0x88] sm:$0x3] %v6329_v13  ;;  %v835_v14 = vld [vmem:[#allocation8 + $0xf0] sm:$0xff]  ;;  %v836_v15 = vld [vmem:[#allocation8 + $0xf8] sm:$0xff] }
  0x9e   : > { %671 = vst [vmem:[#allocation2 + $0x90] sm:$0xff] %v6329_v13  ;;  %672 = vst [vmem:[#allocation2 + $0x98] sm:$0xff] %v6329_v13  ;;  %v5454_v16 = vpack.c.bf16 %v836_v15, %v835_v14  ;;  %v788_v17 = vld [vmem:[#allocation2 + $0x1] sm:$0xff]  ;;  %v1626_v19 = vld [vmem:[#allocation8 + $0x180] sm:$0xff] }
  0x9f   : > { %673 = vst [vmem:[#allocation2 + $0xa0] sm:$0x3] %v6329_v13  ;;  %674 = vst [vmem:[#allocation2 + $0xa8] sm:$0xff] %v6329_v13  ;;  %v1627_v20 = vld [vmem:[#allocation8 + $0x188] sm:$0xff]  ;;  %v1628_v22 = vld [vmem:[#allocation8 + $0x190] sm:$0xff] }
  0xa0   : > { %5417 = vmatpush3.bf16.msra.mxu0 %v5414_v18  ;;  %675 = vst [vmem:[#allocation2 + $0xb0] sm:$0xff] %v6329_v13  ;;  %676 = vst [vmem:[#allocation2 + $0xb8] sm:$0x3] %v6329_v13  ;;  %v789_v18 = vld [vmem:[#allocation2 + $0x9] sm:$0xff]  ;;  %v1631_v26 = vld [vmem:[#allocation8 + $0x1a8] sm:$0xff] }
  0xa1   : > { %5419 = vmatprep.subr.bf16.mxu0 %v5418_v21  ;;  %677 = vst [vmem:[#allocation2 + $0xc0] sm:$0xff] %v6329_v13  ;;  %678 = vst [vmem:[#allocation2 + $0xc8] sm:$0xff] %v6329_v13  ;;  %v1629_v23 = vld [vmem:[#allocation8 + $0x198] sm:$0xff]  ;;  %v1630_v25 = vld [vmem:[#allocation8 + $0x1a0] sm:$0xff] }
  0xa2   : > { %679 = vst [vmem:[#allocation2 + $0xd0] sm:$0x3] %v6329_v13  ;;  %680 = vst [vmem:[#allocation2 + $0xd8] sm:$0xff] %v6329_v13  ;;  %v1632_v28 = vld [vmem:[#allocation8 + $0x1b0] sm:$0xff]  ;;  %v1633_v29 = vld [vmem:[#allocation8 + $0x1b8] sm:$0xff] }
  0xa3   : > { %681 = vst [vmem:[#allocation2 + $0xe0] sm:$0xff] %v6329_v13  ;;  %682 = vst [vmem:[#allocation2 + $0xe8] sm:$0x3] %v6329_v13  ;;  %v1636_v34 = vld [vmem:[#allocation8 + $0x1d0] sm:$0xff]  ;;  %v773_v38 = vld [vmem:[#allocation8 + $0x8] sm:$0xff] }
  0xa4   : > { %5421 = vmatpush3.bf16.msra.mxu0 %v5418_v21  ;;  %683 = vst [vmem:[#allocation2 + $0xf0] sm:$0xff] %v6329_v13  ;;  %684 = vst [vmem:[#allocation2 + $0xf8] sm:$0xff] %v6329_v13  ;;  %v6684_v21 = vpack.c.bf16 %v1627_v20, %v1626_v19  ;;  %v775_v44 = vld [vmem:[#allocation8 + $0x18] sm:$0xff]  ;;  %v776_v48 = vld [vmem:[#allocation8 + $0x20] sm:$0xff] }
  0xa5   : > { %5423 = vmatprep.subr.bf16.mxu0 %v5422_v24  ;;  %685 = vst [vmem:[#allocation2 + $0x100] sm:$0x3] %v6329_v13  ;;  %686 = vst [vmem:[#allocation2 + $0x108] sm:$0xff] %v6329_v13 }
  0xa6   : > { %687 = vst [vmem:[#allocation2 + $0x110] sm:$0xff] %v6329_v13  ;;  %688 = vst [vmem:[#allocation2 + $0x118] sm:$0x3] %v6329_v13  ;;  %5746 = vmatprep.subr.bf16.mxu1 %v6684_v21 }
  0xa7   : > { %689 = vst [vmem:[#allocation2 + $0x120] sm:$0xff] %v6329_v13  ;;  %690 = vst [vmem:[#allocation2 + $0x128] sm:$0xff] %v6329_v13  ;;  %5754 = vmatpush3.bf16.msra.mxu1 %v6684_v21 }
  0xa8   : > { %5425 = vmatpush3.bf16.msra.mxu0 %v5422_v24  ;;  %691 = vst [vmem:[#allocation2 + $0x130] sm:$0x3] %v6329_v13  ;;  %692 = vst [vmem:[#allocation2 + $0x138] sm:$0xff] %v6329_v13  ;;  %v6688_v24 = vpack.c.bf16 %v1629_v23, %v1628_v22 }
  0xa9   : > { %5427 = vmatprep.subr.bf16.mxu0 %v5426_v27  ;;  %693 = vst [vmem:[#allocation2 + $0x140] sm:$0xff] %v6329_v13  ;;  %694 = vst [vmem:[#allocation2 + $0x148] sm:$0x3] %v6329_v13 }
  0xaa   : > { %695 = vst [vmem:[#allocation2 + $0x150] sm:$0xff] %v6329_v13  ;;  %696 = vst [vmem:[#allocation2 + $0x158] sm:$0xff] %v6329_v13  ;;  %5747 = vmatprep.subr.bf16.mxu1 %v6688_v24 }
  0xab   : > { %4547 = vmatmul.mubr.f32.vlgmr.msra.gmra.mrb[0].mxu0 %v342_v30  ;;  %697 = vst [vmem:[#allocation2 + $0x160] sm:$0x3] %v6329_v13  ;;  %698 = vst [vmem:[#allocation2 + $0x168] sm:$0xff] %v6329_v13  ;;  %5755 = vmatpush3.bf16.msra.mxu1 %v6688_v24  ;;  %v6696_v30 = vpack.c.bf16 %v1633_v29, %v1632_v28 }
  0xac   : > { %4549 = vmatprep.mubr.f32.mxu0 %v343_v31  ;;  %5429 = vmatpush3.bf16.msra.mxu0 %v5426_v27  ;;  %699 = vst [vmem:[#allocation2 + $0x170] sm:$0xff] %v6329_v13  ;;  %700 = vst [vmem:[#allocation2 + $0x178] sm:$0x3] %v6329_v13  ;;  %v6692_v27 = vpack.c.bf16 %v1631_v26, %v1630_v25  ;;  %v1634_v31 = vld [vmem:[#allocation8 + $0x1c0] sm:$0xff] }
  0xad   : > { %5431 = vmatprep.subr.bf16.mxu0 %v5430_v32  ;;  %701 = vst [vmem:[#allocation2 + $0x180] sm:$0xff] %v6329_v13  ;;  %702 = vst [vmem:[#allocation2 + $0x188] sm:$0xff] %v6329_v13 }
  0xae   : > { %703 = vst [vmem:[#allocation2 + $0x190] sm:$0x3] %v6329_v13  ;;  %704 = vst [vmem:[#allocation2 + $0x198] sm:$0xff] %v6329_v13  ;;  %5748 = vmatprep.subr.bf16.mxu1 %v6692_v27 }
  0xaf   : > { %4550 = vmatmul.mubr.f32.gmra.mrb[2].mxu0 %v344_v35  ;;  %705 = vst [vmem:[#allocation2 + $0x1a0] sm:$0xff] %v6329_v13  ;;  %706 = vst [vmem:[#allocation2 + $0x1a8] sm:$0x3] %v6329_v13  ;;  %5756 = vmatpush3.bf16.msra.mxu1 %v6692_v27  ;;  %v1637_v35 = vld [vmem:[#allocation8 + $0x1d8] sm:$0xff] }
  0xb0   : > { %4552 = vmatprep.mubr.f32.mxu0 %v345_v36  ;;  %5433 = vmatpush3.bf16.msra.mxu0 %v5430_v32  ;;  %7522 = vst [vmem:[#allocation17_spill] sm:$0xff] %v6696_v30  ;;  %v1635_v32 = vld [vmem:[#allocation8 + $0x1c8] sm:$0xff]  ;;  %v772_v36 = vld [vmem:[#allocation8] sm:$0xff] }
  0xb1   : > { %5435 = vmatprep.subr.bf16.mxu0 %v5434_v37  ;;  %5749 = vmatprep.subr.bf16.mxu1 %v6696_v30  ;;  %v6700_v33 = vpack.c.bf16 %v1635_v32, %v1634_v31  ;;  %v5458_v39 = vpack.c.bf16 %v773_v38, %v772_v36 }
  0xb3   : > { %4553 = vmatmul.mubr.f32.gmra.mrb[4].mxu0 %v346_v40  ;;  %5757 = vmatpush3.bf16.msra.mxu1 %v6696_v30  ;;  %7523 = vst [vmem:[#allocation18_spill] sm:$0xff] %v6700_v33  ;;  %v1638_v40 = vld [vmem:[#allocation8 + $0x1e0] sm:$0xff]  ;;  %v2240_v30 = vld [vmem:[#allocation8 + $0x290] sm:$0xff] }
  0xb4   : > { %4555 = vmatprep.mubr.f32.mxu0 %v347_v41  ;;  %5437 = vmatpush3.bf16.msra.mxu0 %v5434_v37  ;;  %v6704_v37 = vpack.c.bf16 %v1637_v35, %v1636_v34  ;;  %v1639_v41 = vld [vmem:[#allocation8 + $0x1e8] sm:$0xff] }
  0xb5   : > { %5439 = vmatprep.subr.bf16.mxu0 %v5438_v42  ;;  %5750 = vmatprep.subr.bf16.mxu1 %v6700_v33  ;;  %v6708_v43 = vpack.c.bf16 %v1639_v41, %v1638_v40 }
  0xb6   : > { %7524 = vst [vmem:[#allocation19_spill] sm:$0xff] %v6704_v37 }
  0xb7   : > { %4556 = vmatmul.mubr.f32.gmra.mrb[6].mxu0 %v348_v45  ;;  %5758 = vmatpush3.bf16.msra.mxu1 %v6700_v33  ;;  %7525 = vst [vmem:[#allocation20_spill] sm:$0xff] %v6708_v43 }
  0xb8   : > { %4558 = vmatprep.mubr.f32.mxu0 %v349_v46  ;;  %5441 = vmatpush3.bf16.msra.mxu0 %v5438_v42  ;;  %v774_v42 = vld [vmem:[#allocation8 + $0x10] sm:$0xff] }
  0xb9   : > { %5443 = vmatprep.subr.bf16.mxu0 %v5442_v47  ;;  %5751 = vmatprep.subr.bf16.mxu1 %v6704_v37  ;;  %v5462_v45 = vpack.c.bf16 %v775_v44, %v774_v42  ;;  %v1640_v46 = vld [vmem:[#allocation8 + $0x1f0] sm:$0xff] }
  0xbb   : > { %4559 = vmatmul.mubr.f32.gmra.mrb[8].mxu0 %v350_v50  ;;  %5759 = vmatpush3.bf16.msra.mxu1 %v6704_v37  ;;  %v777_v50 = vld [vmem:[#allocation8 + $0x28] sm:$0xff] }
  0xbc   : > { %4561 = vmatprep.mubr.f32.mxu0 %v351_v51  ;;  %5445 = vmatpush3.bf16.msra.mxu0 %v5442_v47  ;;  %v1641_v47 = vld [vmem:[#allocation8 + $0x1f8] sm:$0xff]  ;;  %v5466_v51 = vpack.c.bf16 %v777_v50, %v776_v48  ;;  %v1325_v37 = vld [vmem:[#allocation8 + $0x128] sm:$0xff] }
  0xbd   : > { %5447 = vmatprep.subr.bf16.mxu0 %v5446_v52  ;;  %5752 = vmatprep.subr.bf16.mxu1 %v6708_v43  ;;  %v6712_v49 = vpack.c.bf16 %v1641_v47, %v1640_v46 }
  0xbf   : > { %4562 = vmatmul.mubr.f32.gmra.mrb[10].mxu0 %v352_v53  ;;  %5760 = vmatpush3.bf16.msra.mxu1 %v6708_v43  ;;  %7526 = vst [vmem:[#allocation21_spill] sm:$0xff] %v6712_v49  ;;  %v1933_v53 = vld [vmem:[#allocation8 + $0x208] sm:$0xff] }
  0xc0   : > { %4564 = vmatprep.mubr.f32.mxu0 %v353_v54  ;;  %5449 = vmatpush3.bf16.msra.mxu0 %v5446_v52  ;;  %v1932_v52 = vld [vmem:[#allocation8 + $0x200] sm:$0xff]  ;;  %v778_v54 = vld [vmem:[#allocation8 + $0x30] sm:$0xff] }
  0xc1   : > { %5451 = vmatprep.subr.bf16.mxu0 %v5450_v12  ;;  %5753 = vmatprep.subr.bf16.mxu1 %v6712_v49 }
  0xc3   : > { %4565 = vmatmul.mubr.f32.gmra.mrb[12].mxu0 %v354_v55  ;;  %5761 = vmatpush3.bf16.msra.mxu1 %v6712_v49  ;;  %v6716_v55 = vpack.c.bf16 %v1933_v53, %v1932_v52  ;;  %v1947_v49 = vld [vmem:[#allocation8 + $0x278] sm:$0xff] }
  0xc4   : > { %4567 = vmatprep.mubr.f32.mxu0 %v355_v56  ;;  %5453 = vmatpush3.bf16.msra.mxu0 %v5450_v12  ;;  %v779_v56 = vld [vmem:[#allocation8 + $0x38] sm:$0xff] }
  0xc5   : > { %5455 = vmatprep.subr.bf16.mxu0 %v5454_v16  ;;  %5555 = vmatprep.subr.bf16.mxu1 %v6716_v55 }
  0xc7   : > { %4568 = vmatmul.mubr.f32.gmra.mrb[14].mxu0 %v356_v57  ;;  %v5470_v57 = vpack.c.bf16 %v779_v56, %v778_v54 }
  0xc8   : > { %4570 = vmatprep.mubr.f32.mxu0 %v357_v58  ;;  %5457 = vmatpush3.bf16.msra.mxu0 %v5454_v16  ;;  %v780_v58 = vld [vmem:[#allocation8 + $0x40] sm:$0xff] }
  0xc9   : > { %5459 = vmatprep.subr.bf16.mxu0 %v5458_v39 }
  0xcb   : > { %4571 = vmatmul.mubr.f32.gmra.mrb[16].mxu0 %v358_v59  ;;  %v781_v59 = vld [vmem:[#allocation8 + $0x48] sm:$0xff] }
  0xcc   : > { %4573 = vmatprep.mubr.f32.mxu0 %v359_v60  ;;  %v5474_v60 = vpack.c.bf16 %v781_v59, %v780_v58 }
  0xcf   : > { %4574 = vmatmul.mubr.f32.gmra.mrb[18].mxu0 %v360_v61  ;;  %v782_v61 = vld [vmem:[#allocation8 + $0x50] sm:$0xff] }
  0xd0   : > { %4576 = vmatprep.mubr.f32.mxu0 %v361_v62  ;;  %v783_v62 = vld [vmem:[#allocation8 + $0x58] sm:$0xff] }
  0xd3   : > { %4577 = vmatmul.mubr.f32.gmra.mrb[20].mxu0 %v362_v63  ;;  %v5478_v63 = vpack.c.bf16 %v783_v62, %v782_v61 }
  0xd4   : > { %4579 = vmatprep.mubr.f32.mxu0 %v363_v0  ;;  %v784_v0 = vld [vmem:[#allocation8 + $0x60] sm:$0xff] }
  0xd7   : > { %4580 = vmatmul.mubr.f32.gmra.mrb[22].mxu0 %v364_v1  ;;  %v785_v1 = vld [vmem:[#allocation8 + $0x68] sm:$0xff] }
  0xd8   : > { %4582 = vmatprep.mubr.f32.mxu0 %v365_v2  ;;  %v5482_v2 = vpack.c.bf16 %v785_v1, %v784_v0 }
  0xdb   : > { %4583 = vmatmul.mubr.f32.gmra.mrb[24].mxu0 %v366_v3  ;;  %v786_v3 = vld [vmem:[#allocation8 + $0x70] sm:$0xff] }
  0xdc   : > { %4585 = vmatprep.mubr.f32.mxu0 %v367_v4  ;;  %v787_v4 = vld [vmem:[#allocation8 + $0x78] sm:$0xff] }
  0xdf   : > { %4586 = vmatmul.mubr.f32.gmra.mrb[26].mxu0 %v368_v5  ;;  %v5486_v5 = vpack.c.bf16 %v787_v4, %v786_v3 }
  0xe0   : > { %4588 = vmatprep.mubr.f32.mxu0 %v369_v6  ;;  %v1320_v6 = vld [vmem:[#allocation8 + $0x100] sm:$0xff] }
  0xe3   : > { %4589 = vmatmul.mubr.f32.gmra.mrb[28].mxu0 %v370_v7  ;;  %v1321_v7 = vld [vmem:[#allocation8 + $0x108] sm:$0xff] }
  0xe4   : > { %4591 = vmatprep.mubr.f32.mxu0 %v371_v8  ;;  %v6719_v8 = vpack.c.bf16 %v1321_v7, %v1320_v6 }
  0xe7   : > { %4592 = vmatmul.mubr.f32.gmra.mrb[30].mxu0 %v372_v9  ;;  %v6725_v9 = vld [vmem:[%s7477_s2] ss:$0 sm:$0xff] }
  0xe8   : > { %4626 = vmatprep.mubr.f32.mxu0 %v788_v17 }
  0xeb   : > { %4627 = vmatmul.mubr.f32.vlgmr.msra.gmra.mrb[32].mxu0 %v789_v18 }
  0xec   : > { %5461 = vmatpush3.bf16.msra.mxu0 %v5458_v39 }
  0xed   : > { %5463 = vmatprep.subr.bf16.mxu0 %v5462_v45 }
  0xf0   : > { %5465 = vmatpush3.bf16.msra.mxu0 %v5462_v45 }
  0xf1   : > { %5467 = vmatprep.subr.bf16.mxu0 %v5466_v51 }
  0xf4   : > { %5469 = vmatpush3.bf16.msra.mxu0 %v5466_v51 }
  0xf5   : > { %5471 = vmatprep.subr.bf16.mxu0 %v5470_v57 }
  0xf8   : > { %5473 = vmatpush3.bf16.msra.mxu0 %v5470_v57 }
  0xf9   : > { %5475 = vmatprep.subr.bf16.mxu0 %v5474_v60 }
  0xfc   : > { %5477 = vmatpush3.bf16.msra.mxu0 %v5474_v60 }
  0xfd   : > { %5479 = vmatprep.subr.bf16.mxu0 %v5478_v63 }
 0x100   : > { %5481 = vmatpush3.bf16.msra.mxu0 %v5478_v63 }
 0x101   : > { %5483 = vmatprep.subr.bf16.mxu0 %v5482_v2 }
 0x104   : > { %5485 = vmatpush3.bf16.msra.mxu0 %v5482_v2 }
 0x105   : > { %5487 = vmatprep.subr.bf16.mxu0 %v5486_v5 }
 0x108   : > { %5489 = vmatpush3.bf16.msra.mxu0 %v5486_v5 }
 0x109   : > { %5491 = vmatprep.subr.bf16.mxu0 %v6719_v8 }
 0x17e   : > { %v4548_v10 = vpop.f32.mrb[0].mxu0 }
 0x17f   : > { %v468_v11 = vadd.f32 %v4548_v10, %v6725_v9  ;;  %v462_v12 = vpop.f32.mrb[1].mxu0 }
 0x180   : > { %v463_v14 = vadd.f32 %v6725_v9, %v462_v12 }
 0x181   : > { %v6729_v15 = vmax.f32 %v468_v11, 0.0 }
 0x182   : > { %v6731_v16 = vmax.f32 %v463_v14, 0.0  ;;  %v4551_v17 = vpop.f32.mrb[2].mxu0 }
 0x183   : > { %709 = vst [vmem:[#allocation2 + $0x21] sm:$0xff] %v6729_v15  ;;  %v478_v18 = vadd.f32 %v4551_v17, %v6725_v9  ;;  %v472_v19 = vpop.f32.mrb[3].mxu0 }
 0x184   : > { %708 = vst [vmem:[#allocation2 + $0x19] sm:$0xff] %v6731_v16  ;;  %v473_v20 = vadd.f32 %v6725_v9, %v472_v19  ;;  %4629 = vmatprep.mubr.f32.mxu0 %v6731_v16 }
 0x185   : > { %v6738_v22 = vmax.f32 %v478_v18, 0.0  ;;  %4630 = vmatmul.mubr.f32.gmra.mrb[34].mxu0 %v6729_v15 }
 0x186   : > { %v6741_v23 = vmax.f32 %v473_v20, 0.0  ;;  %v4554_v25 = vpop.f32.mrb[4].mxu0 }
 0x187   : > { %711 = vst [vmem:[#allocation2 + $0x39] sm:$0xff] %v6738_v22  ;;  %v488_v26 = vadd.f32 %v4554_v25, %v6725_v9  ;;  %v482_v28 = vpop.f32.mrb[5].mxu0 }
 0x188   : > { %710 = vst [vmem:[#allocation2 + $0x31] sm:$0xff] %v6741_v23  ;;  %v483_v29 = vadd.f32 %v6725_v9, %v482_v28  ;;  %4632 = vmatprep.mubr.f32.mxu0 %v6741_v23 }
 0x189   : > { %v6748_v31 = vmax.f32 %v488_v26, 0.0  ;;  %4633 = vmatmul.mubr.f32.gmra.mrb[36].mxu0 %v6738_v22 }
 0x18a   : > { %v6751_v32 = vmax.f32 %v483_v29, 0.0  ;;  %v4557_v34 = vpop.f32.mrb[6].mxu0 }
 0x18b   : > { %713 = vst [vmem:[#allocation2 + $0x51] sm:$0xff] %v6748_v31  ;;  %v498_v35 = vadd.f32 %v4557_v34, %v6725_v9  ;;  %v492_v36 = vpop.f32.mrb[7].mxu0  ;;  %v1934_v34 = vld [vmem:[#allocation8 + $0x210] sm:$0xff] }
 0x18c   : > { %712 = vst [vmem:[#allocation2 + $0x49] sm:$0xff] %v6751_v32  ;;  %v493_v38 = vadd.f32 %v6725_v9, %v492_v36  ;;  %4635 = vmatprep.mubr.f32.mxu0 %v6751_v32 }
 0x18d   : > { %v6758_v39 = vmax.f32 %v498_v35, 0.0  ;;  %4636 = vmatmul.mubr.f32.gmra.mrb[38].mxu0 %v6748_v31  ;;  %v1935_v35 = vld [vmem:[#allocation8 + $0x218] sm:$0xff] }
 0x18e   : > { %v6761_v40 = vmax.f32 %v493_v38, 0.0  ;;  %v4560_v41 = vpop.f32.mrb[8].mxu0 }
 0x18f   : > { %715 = vst [vmem:[#allocation2 + $0x69] sm:$0xff] %v6758_v39  ;;  %v508_v42 = vadd.f32 %v4560_v41, %v6725_v9  ;;  %v502_v44 = vpop.f32.mrb[9].mxu0 }
 0x190   : > { %714 = vst [vmem:[#allocation2 + $0x61] sm:$0xff] %v6761_v40  ;;  %v503_v45 = vadd.f32 %v6725_v9, %v502_v44  ;;  %4638 = vmatprep.mubr.f32.mxu0 %v6761_v40 }
 0x191   : > { %v6768_v46 = vmax.f32 %v508_v42, 0.0  ;;  %4639 = vmatmul.mubr.f32.gmra.mrb[40].mxu0 %v6758_v39 }
 0x192   : > { %v6771_v47 = vmax.f32 %v503_v45, 0.0  ;;  %v4563_v48 = vpop.f32.mrb[10].mxu0 }
 0x193   : > { %717 = vst [vmem:[#allocation2 + $0x81] sm:$0xff] %v6768_v46  ;;  %v518_v50 = vadd.f32 %v4563_v48, %v6725_v9  ;;  %v512_v51 = vpop.f32.mrb[11].mxu0 }
 0x194   : > { %716 = vst [vmem:[#allocation2 + $0x79] sm:$0xff] %v6771_v47  ;;  %v513_v52 = vadd.f32 %v6725_v9, %v512_v51  ;;  %4641 = vmatprep.mubr.f32.mxu0 %v6771_v47 }
 0x195   : > { %v6778_v53 = vmax.f32 %v518_v50, 0.0  ;;  %4642 = vmatmul.mubr.f32.gmra.mrb[42].mxu0 %v6768_v46  ;;  %v5558_v50 = vpack.c.bf16 %v1935_v35, %v1934_v34  ;;  %v1940_v34 = vld [vmem:[#allocation8 + $0x240] sm:$0xff]  ;;  %v1941_v35 = vld [vmem:[#allocation8 + $0x248] sm:$0xff] }
 0x196   : > { %v6781_v54 = vmax.f32 %v513_v52, 0.0  ;;  %v4566_v56 = vpop.f32.mrb[12].mxu0  ;;  %v1936_v52 = vld [vmem:[#allocation8 + $0x220] sm:$0xff] }
 0x197   : > { %719 = vst [vmem:[#allocation2 + $0x99] sm:$0xff] %v6778_v53  ;;  %v528_v57 = vadd.f32 %v4566_v56, %v6725_v9  ;;  %v522_v58 = vpop.f32.mrb[13].mxu0  ;;  %v1937_v56 = vld [vmem:[#allocation8 + $0x228] sm:$0xff] }
 0x198   : > { %718 = vst [vmem:[#allocation2 + $0x91] sm:$0xff] %v6781_v54  ;;  %v523_v59 = vadd.f32 %v6725_v9, %v522_v58  ;;  %4644 = vmatprep.mubr.f32.mxu0 %v6781_v54 }
 0x199   : > { %v6788_v60 = vmax.f32 %v528_v57, 0.0  ;;  %4645 = vmatmul.mubr.f32.gmra.mrb[44].mxu0 %v6778_v53 }
 0x19a   : > { %v6791_v61 = vmax.f32 %v523_v59, 0.0  ;;  %v4569_v62 = vpop.f32.mrb[14].mxu0 }
 0x19b   : > { %721 = vst [vmem:[#allocation2 + $0xb1] sm:$0xff] %v6788_v60  ;;  %v538_v63 = vadd.f32 %v4569_v62, %v6725_v9  ;;  %v532_v0 = vpop.f32.mrb[15].mxu0 }
 0x19c   : > { %720 = vst [vmem:[#allocation2 + $0xa9] sm:$0xff] %v6791_v61  ;;  %v533_v1 = vadd.f32 %v6725_v9, %v532_v0  ;;  %4647 = vmatprep.mubr.f32.mxu0 %v6791_v61 }
 0x19d   : > { %v6798_v2 = vmax.f32 %v538_v63, 0.0  ;;  %4648 = vmatmul.mubr.f32.gmra.mrb[46].mxu0 %v6788_v60 }
 0x19e   : > { %v6801_v3 = vmax.f32 %v533_v1, 0.0  ;;  %v4572_v4 = vpop.f32.mrb[16].mxu0 }
 0x19f   : > { %723 = vst [vmem:[#allocation2 + $0xc9] sm:$0xff] %v6798_v2  ;;  %v548_v5 = vadd.f32 %v4572_v4, %v6725_v9  ;;  %v542_v6 = vpop.f32.mrb[17].mxu0  ;;  %v5562_v4 = vpack.c.bf16 %v1937_v56, %v1936_v52 }
 0x1a0   : > { %722 = vst [vmem:[#allocation2 + $0xc1] sm:$0xff] %v6801_v3  ;;  %v543_v7 = vadd.f32 %v6725_v9, %v542_v6  ;;  %4650 = vmatprep.mubr.f32.mxu0 %v6801_v3  ;;  %v1939_v6 = vld [vmem:[#allocation8 + $0x238] sm:$0xff] }
 0x1a1   : > { %v6808_v10 = vmax.f32 %v548_v5, 0.0  ;;  %4651 = vmatmul.mubr.f32.gmra.mrb[48].mxu0 %v6798_v2 }
 0x1a2   : > { %v6811_v11 = vmax.f32 %v543_v7, 0.0  ;;  %v4575_v12 = vpop.f32.mrb[18].mxu0 }
 0x1a3   : > { %725 = vst [vmem:[#allocation2 + $0xe1] sm:$0xff] %v6808_v10  ;;  %v558_v14 = vadd.f32 %v4575_v12, %v6725_v9  ;;  %v552_v17 = vpop.f32.mrb[19].mxu0 }
 0x1a4   : > { %724 = vst [vmem:[#allocation2 + $0xd9] sm:$0xff] %v6811_v11  ;;  %v553_v18 = vadd.f32 %v6725_v9, %v552_v17  ;;  %4653 = vmatprep.mubr.f32.mxu0 %v6811_v11 }
 0x1a5   : > { %v6818_v19 = vmax.f32 %v558_v14, 0.0  ;;  %4654 = vmatmul.mubr.f32.gmra.mrb[50].mxu0 %v6808_v10 }
 0x1a6   : > { %v6821_v20 = vmax.f32 %v553_v18, 0.0  ;;  %v4578_v25 = vpop.f32.mrb[20].mxu0 }
 0x1a7   : > { %727 = vst [vmem:[#allocation2 + $0xf9] sm:$0xff] %v6818_v19  ;;  %v568_v26 = vadd.f32 %v4578_v25, %v6725_v9  ;;  %v562_v28 = vpop.f32.mrb[21].mxu0 }
 0x1a8   : > { %726 = vst [vmem:[#allocation2 + $0xf1] sm:$0xff] %v6821_v20  ;;  %v563_v29 = vadd.f32 %v6725_v9, %v562_v28  ;;  %4656 = vmatprep.mubr.f32.mxu0 %v6821_v20 }
 0x1a9   : > { %v6828_v36 = vmax.f32 %v568_v26, 0.0  ;;  %4657 = vmatmul.mubr.f32.gmra.mrb[52].mxu0 %v6818_v19 }
 0x1aa   : > { %v6831_v38 = vmax.f32 %v563_v29, 0.0  ;;  %v4581_v41 = vpop.f32.mrb[22].mxu0 }
 0x1ab   : > { %729 = vst [vmem:[#allocation2 + $0x111] sm:$0xff] %v6828_v36  ;;  %v578_v42 = vadd.f32 %v4581_v41, %v6725_v9  ;;  %v572_v44 = vpop.f32.mrb[23].mxu0  ;;  %v6835_v45 = vld [vmem:[#allocation2 + $0xd8] sm:$0xff]  ;;  %v6837_v48 = vld [vmem:[#allocation2 + $0xe0] sm:$0xff] }
 0x1ac   : > { %728 = vst [vmem:[#allocation2 + $0x109] sm:$0xff] %v6831_v38  ;;  %v573_v51 = vadd.f32 %v6725_v9, %v572_v44  ;;  %4890 = vmatprep.mubr.f32.mxu1 %v6835_v45  ;;  %4659 = vmatprep.mubr.f32.mxu0 %v6831_v38 }
 0x1ad   : > { %v6843_v57 = vmax.f32 %v578_v42, 0.0  ;;  %4891 = vmatmul.mubr.f32.vlgmr.msra.gmra.mrb[0].mxu1 %v6837_v48  ;;  %4660 = vmatmul.mubr.f32.gmra.mrb[54].mxu0 %v6828_v36 }
 0x1ae   : > { %v6847_v58 = vmax.f32 %v573_v51, 0.0  ;;  %5557 = vmatpush3.bf16.msra.mxu1 %v6716_v55  ;;  %v4584_v59 = vpop.f32.mrb[24].mxu0  ;;  %v1938_v55 = vld [vmem:[#allocation8 + $0x230] sm:$0xff] }
 0x1af   : > { %731 = vst [vmem:[#allocation2 + $0x129] sm:$0xff] %v6843_v57  ;;  %v588_v62 = vadd.f32 %v4584_v59, %v6725_v9  ;;  %v582_v63 = vpop.f32.mrb[25].mxu0  ;;  %v6852_v0 = vld [vmem:[#allocation2 + $0xf0] sm:$0xff]  ;;  %5559 = vmatprep.subr.bf16.mxu1 %v5558_v50  ;;  %v6854_v1 = vld [vmem:[#allocation2 + $0xf8] sm:$0xff]  ;;  %v5566_v28 = vpack.c.bf16 %v1939_v6, %v1938_v55  ;;  %v5570_v59 = vpack.c.bf16 %v1941_v35, %v1940_v34 }
 0x1b0   : > { %730 = vst [vmem:[#allocation2 + $0x121] sm:$0xff] %v6847_v58  ;;  %v583_v5 = vadd.f32 %v6725_v9, %v582_v63  ;;  %4893 = vmatprep.mubr.f32.mxu1 %v6852_v0  ;;  %4662 = vmatprep.mubr.f32.mxu0 %v6847_v58  ;;  %v1942_v63 = vld [vmem:[#allocation8 + $0x250] sm:$0xff] }
 0x1b1   : > { %v6860_v7 = vmax.f32 %v588_v62, 0.0  ;;  %4894 = vmatmul.mubr.f32.gmra.mrb[2].mxu1 %v6854_v1  ;;  %4663 = vmatmul.mubr.f32.gmra.mrb[56].mxu0 %v6843_v57 }
 0x1b2   : > { %v6864_v12 = vmax.f32 %v583_v5, 0.0  ;;  %5561 = vmatpush3.bf16.msra.mxu1 %v5558_v50  ;;  %v4587_v14 = vpop.f32.mrb[26].mxu0 }
 0x1b3   : > { %733 = vst [vmem:[#allocation2 + $0x141] sm:$0xff] %v6860_v7  ;;  %v598_v17 = vadd.f32 %v4587_v14, %v6725_v9  ;;  %v592_v18 = vpop.f32.mrb[27].mxu0  ;;  %v6868_v25 = vld [vmem:[#allocation2 + $0x108] sm:$0xff]  ;;  %5563 = vmatprep.subr.bf16.mxu1 %v5562_v4  ;;  %v6870_v26 = vld [vmem:[#allocation2 + $0x110] sm:$0xff] }
 0x1b4   : > { %732 = vst [vmem:[#allocation2 + $0x139] sm:$0xff] %v6864_v12  ;;  %v593_v29 = vadd.f32 %v6725_v9, %v592_v18  ;;  %4896 = vmatprep.mubr.f32.mxu1 %v6868_v25  ;;  %4665 = vmatprep.mubr.f32.mxu0 %v6864_v12 }
 0x1b5   : > { %v6876_v41 = vmax.f32 %v598_v17, 0.0  ;;  %4897 = vmatmul.mubr.f32.gmra.mrb[4].mxu1 %v6870_v26  ;;  %4666 = vmatmul.mubr.f32.gmra.mrb[58].mxu0 %v6860_v7 }
 0x1b6   : > { %v6880_v42 = vmax.f32 %v593_v29, 0.0  ;;  %5565 = vmatpush3.bf16.msra.mxu1 %v5562_v4  ;;  %v4590_v44 = vpop.f32.mrb[28].mxu0  ;;  %v1943_v4 = vld [vmem:[#allocation8 + $0x258] sm:$0xff] }
 0x1b7   : > { %735 = vst [vmem:[#allocation2 + $0x159] sm:$0xff] %v6876_v41  ;;  %v608_v50 = vadd.f32 %v4590_v44, %v6725_v9  ;;  %v602_v51 = vpop.f32.mrb[29].mxu0  ;;  %v6884_v52 = vld [vmem:[#allocation2 + $0x120] sm:$0xff]  ;;  %5567 = vmatprep.subr.bf16.mxu1 %v5566_v28  ;;  %v6886_v56 = vld [vmem:[#allocation2 + $0x128] sm:$0xff]  ;;  %v5574_v34 = vpack.c.bf16 %v1943_v4, %v1942_v63  ;;  %v1945_v44 = vld [vmem:[#allocation8 + $0x268] sm:$0xff] }
 0x1b8   : > { %734 = vst [vmem:[#allocation2 + $0x151] sm:$0xff] %v6880_v42  ;;  %v603_v62 = vadd.f32 %v6725_v9, %v602_v51  ;;  %4899 = vmatprep.mubr.f32.mxu1 %v6884_v52  ;;  %4668 = vmatprep.mubr.f32.mxu0 %v6880_v42  ;;  %v1322_v51 = vld [vmem:[#allocation8 + $0x110] sm:$0xff] }
 0x1b9   : > { %v6892_v5 = vmax.f32 %v608_v50, 0.0  ;;  %4900 = vmatmul.mubr.f32.gmra.mrb[6].mxu1 %v6886_v56  ;;  %4669 = vmatmul.mubr.f32.gmra.mrb[60].mxu0 %v6876_v41 }
 0x1ba   : > { %v6896_v55 = vmax.f32 %v603_v62, 0.0  ;;  %5569 = vmatpush3.bf16.msra.mxu1 %v5566_v28  ;;  %v4593_v6 = vpop.f32.mrb[30].mxu0  ;;  %v1944_v28 = vld [vmem:[#allocation8 + $0x260] sm:$0xff]  ;;  %v1323_v62 = vld [vmem:[#allocation8 + $0x118] sm:$0xff] }
 0x1bb   : > { %737 = vst [vmem:[#allocation2 + $0x171] sm:$0xff] %v6892_v5  ;;  %v6900_v14 = vadd.f32 %v4593_v6, %v6725_v9  ;;  %v612_v17 = vpop.f32.mrb[31].mxu0  ;;  %v6902_v18 = vld [vmem:[#allocation2 + $0x138] sm:$0xff]  ;;  %5571 = vmatprep.subr.bf16.mxu1 %v5570_v59  ;;  %v6904_v29 = vld [vmem:[#allocation2 + $0x140] sm:$0xff]  ;;  %v5578_v6 = vpack.c.bf16 %v1945_v44, %v1944_v28  ;;  %v5494_v43 = vpack.c.bf16 %v1323_v62, %v1322_v51  ;;  %v2238_v51 = vld [vmem:[#allocation8 + $0x280] sm:$0xff] }
 0x1bc   : > { %736 = vst [vmem:[#allocation2 + $0x169] sm:$0xff] %v6896_v55  ;;  %v6908_v35 = vadd.f32 %v6725_v9, %v612_v17  ;;  %4902 = vmatprep.mubr.f32.mxu1 %v6902_v18  ;;  %4671 = vmatprep.mubr.f32.mxu0 %v6896_v55  ;;  %v1946_v17 = vld [vmem:[#allocation8 + $0x270] sm:$0xff]  ;;  %v2239_v62 = vld [vmem:[#allocation8 + $0x288] sm:$0xff] }
 0x1bd   : > { %7527 = vst [vmem:[#allocation22_spill] sm:$0xff] %v6900_v14  ;;  %v7491_v50 = vmax.f32 %v6900_v14, 0.0  ;;  %4903 = vmatmul.mubr.f32.gmra.mrb[8].mxu1 %v6904_v29  ;;  %4672 = vmatmul.mubr.f32.gmra.mrb[62].mxu0 %v6892_v5  ;;  %v2241_v14 = vld [vmem:[#allocation8 + $0x298] sm:$0xff] }
 0x1be   : > { %v7494_v63 = vmax.f32 %v6908_v35, 0.0  ;;  %5573 = vmatpush3.bf16.msra.mxu1 %v5570_v59  ;;  %4706 = vmatprep.mubr.f32.mxu0 %v6329_v13  ;;  %v6928_v59 = vld [vmem:[#allocation2 + $0x18] sm:$0xff] }
 0x1bf   : > { %739 = vst [vmem:[#allocation2 + $0x189] sm:$0xff] %v7491_v50  ;;  %v6919_v9 = vld [vmem:[#allocation2 + $0x150] sm:$0xff]  ;;  %5575 = vmatprep.subr.bf16.mxu1 %v5574_v34  ;;  %v6921_v4 = vld [vmem:[#allocation2 + $0x158] sm:$0xff]  ;;  %7528 = vst [vmem:[#allocation23_spill] sm:$0xff] %v6928_v59 }
 0x1c0   : > { %738 = vst [vmem:[#allocation2 + $0x181] sm:$0xff] %v7494_v63  ;;  %4905 = vmatprep.mubr.f32.mxu1 %v6919_v9  ;;  %v1324_v50 = vld [vmem:[#allocation8 + $0x120] sm:$0xff]  ;;  %v5582_v63 = vpack.c.bf16 %v1947_v49, %v1946_v17  ;;  %v5586_v17 = vpack.c.bf16 %v2239_v62, %v2238_v51 }
 0x1c1   : > { %4906 = vmatmul.mubr.f32.gmra.mrb[10].mxu1 %v6921_v4  ;;  %4707 = vmatmul.mubr.f32.vlgmr.msra.gmra.mrb[32].mxu0 %v6329_v13  ;;  %v6937_v13 = vld [vmem:[#allocation2 + $0x20] sm:$0xff]  ;;  %v5498_v33 = vpack.c.bf16 %v1325_v37, %v1324_v50  ;;  %v1327_v50 = vld [vmem:[#allocation8 + $0x138] sm:$0xff]  ;;  %v6951_v51 = vld [vmem:[#allocation2 + $0x50] sm:$0xff] }
 0x1c2   : > { %5577 = vmatpush3.bf16.msra.mxu1 %v5574_v34  ;;  %4709 = vmatprep.mubr.f32.mxu0 %v6928_v59  ;;  %v6941_v34 = vld [vmem:[#allocation2 + $0x30] sm:$0xff]  ;;  %v6944_v59 = vld [vmem:[#allocation2 + $0x38] sm:$0xff]  ;;  %v1326_v37 = vld [vmem:[#allocation8 + $0x130] sm:$0xff] }
 0x1c3   : > { %v6931_v28 = vld [vmem:[#allocation2 + $0x168] sm:$0xff]  ;;  %5579 = vmatprep.subr.bf16.mxu1 %v5578_v6  ;;  %v6933_v44 = vld [vmem:[#allocation2 + $0x170] sm:$0xff]  ;;  %5493 = vmatpush3.bf16.msra.mxu0 %v6719_v8  ;;  %7529 = vst [vmem:[#allocation24_spill] sm:$0xff] %v6941_v34 }
 0x1c4   : > { %4908 = vmatprep.mubr.f32.mxu1 %v6931_v28  ;;  %5495 = vmatprep.subr.bf16.mxu0 %v5494_v43  ;;  %v2242_v62 = vld [vmem:[#allocation8 + $0x2a0] sm:$0xff] }
 0x1c5   : > { %4909 = vmatmul.mubr.f32.gmra.mrb[12].mxu1 %v6933_v44  ;;  %4710 = vmatmul.mubr.f32.gmra.mrb[34].mxu0 %v6937_v13 }
 0x1c6   : > { %5581 = vmatpush3.bf16.msra.mxu1 %v5578_v6  ;;  %4712 = vmatprep.mubr.f32.mxu0 %v6941_v34  ;;  %v6948_v6 = vld [vmem:[#allocation2 + $0x48] sm:$0xff]  ;;  %v5502_v34 = vpack.c.bf16 %v1327_v50, %v1326_v37  ;;  %v6967_v37 = vld [vmem:[#allocation2 + $0x80] sm:$0xff]  ;;  %v2246_v50 = vld [vmem:[#allocation8 + $0x2c0] sm:$0xff] }
 0x1c7   : > { %v1623_v49 = vld [vmem:[#allocation2 + $0x180] sm:$0xff]  ;;  %5583 = vmatprep.subr.bf16.mxu1 %v5582_v63  ;;  %v1624_v8 = vld [vmem:[#allocation2 + $0x188] sm:$0xff]  ;;  %5497 = vmatpush3.bf16.msra.mxu0 %v5494_v43  ;;  %v5590_v43 = vpack.c.bf16 %v2241_v14, %v2240_v30 }
 0x1c8   : > { %4911 = vmatprep.mubr.f32.mxu1 %v1623_v49  ;;  %5499 = vmatprep.subr.bf16.mxu0 %v5498_v33  ;;  %v2243_v49 = vld [vmem:[#allocation8 + $0x2a8] sm:$0xff]  ;;  %v6959_v30 = vld [vmem:[#allocation2 + $0x68] sm:$0xff]  ;;  %v2244_v14 = vld [vmem:[#allocation8 + $0x2b0] sm:$0xff] }
 0x1c9   : > { %4912 = vmatmul.mubr.f32.gmra.mrb[14].mxu1 %v1624_v8  ;;  %4713 = vmatmul.mubr.f32.gmra.mrb[36].mxu0 %v6944_v59  ;;  %7530 = vst [vmem:[#allocation25_spill] sm:$0xff] %v6959_v30  ;;  %v2245_v8 = vld [vmem:[#allocation8 + $0x2b8] sm:$0xff] }
 0x1ca   : > { %5585 = vmatpush3.bf16.msra.mxu1 %v5582_v63  ;;  %4946 = vmatprep.mubr.f32.mxu1 %v6731_v16  ;;  %v6956_v16 = vld [vmem:[#allocation2 + $0x60] sm:$0xff]  ;;  %v5594_v63 = vpack.c.bf16 %v2243_v49, %v2242_v62 }
 0x1cb   : > { %5587 = vmatprep.subr.bf16.mxu1 %v5586_v17  ;;  %4715 = vmatprep.mubr.f32.mxu0 %v6948_v6  ;;  %v1330_v49 = vld [vmem:[#allocation8 + $0x150] sm:$0xff] }
 0x1cc   : > { %5501 = vmatpush3.bf16.msra.mxu0 %v5498_v33  ;;  %v1328_v33 = vld [vmem:[#allocation8 + $0x140] sm:$0xff] }
 0x1cd   : > { %4947 = vmatmul.mubr.f32.vlgmr.msra.gmra.mrb[16].mxu1 %v6729_v15  ;;  %4716 = vmatmul.mubr.f32.gmra.mrb[38].mxu0 %v6951_v51  ;;  %v1329_v15 = vld [vmem:[#allocation8 + $0x148] sm:$0xff] }
 0x1ce   : > { %5589 = vmatpush3.bf16.msra.mxu1 %v5586_v17  ;;  %4949 = vmatprep.mubr.f32.mxu1 %v6741_v23  ;;  %v6964_v23 = vld [vmem:[#allocation2 + $0x78] sm:$0xff]  ;;  %v5598_v17 = vpack.c.bf16 %v2245_v8, %v2244_v14  ;;  %v5506_v62 = vpack.c.bf16 %v1329_v15, %v1328_v33  ;;  %v2249_v8 = vld [vmem:[#allocation8 + $0x2d8] sm:$0xff]  ;;  %v6983_v15 = vld [vmem:[#allocation2 + $0xb0] sm:$0xff] }
 0x1cf   : > { %5591 = vmatprep.subr.bf16.mxu1 %v5590_v43  ;;  %4718 = vmatprep.mubr.f32.mxu0 %v6956_v16  ;;  %v6979_v33 = vld [vmem:[#allocation2 + $0xa8] sm:$0xff] }
 0x1d0   : > { %5503 = vmatprep.subr.bf16.mxu0 %v5502_v34 }
 0x1d1   : > { %4950 = vmatmul.mubr.f32.gmra.mrb[18].mxu1 %v6738_v22  ;;  %4719 = vmatmul.mubr.f32.gmra.mrb[40].mxu0 %v6959_v30  ;;  %v2247_v22 = vld [vmem:[#allocation8 + $0x2c8] sm:$0xff]  ;;  %v1331_v30 = vld [vmem:[#allocation8 + $0x158] sm:$0xff] }
 0x1d2   : > { %4952 = vmatprep.mubr.f32.mxu1 %v6751_v32  ;;  %5593 = vmatpush3.bf16.msra.mxu1 %v5590_v43  ;;  %v6972_v32 = vld [vmem:[#allocation2 + $0x90] sm:$0xff]  ;;  %v6975_v43 = vld [vmem:[#allocation2 + $0x98] sm:$0xff]  ;;  %v5602_v14 = vpack.c.bf16 %v2247_v22, %v2246_v50 }
 0x1d3   : > { %4721 = vmatprep.mubr.f32.mxu0 %v6964_v23  ;;  %5595 = vmatprep.subr.bf16.mxu1 %v5594_v63  ;;  %7531 = vst [vmem:[#allocation26_spill] sm:$0xff] %v6975_v43  ;;  %v2250_v22 = vld [vmem:[#allocation8 + $0x2e0] sm:$0xff] }
 0x1d4   : > { %5505 = vmatpush3.bf16.msra.mxu0 %v5502_v34  ;;  %v2248_v34 = vld [vmem:[#allocation8 + $0x2d0] sm:$0xff] }
 0x1d5   : > { %4953 = vmatmul.mubr.f32.gmra.mrb[20].mxu1 %v6748_v31  ;;  %4722 = vmatmul.mubr.f32.gmra.mrb[42].mxu0 %v6967_v37  ;;  %v5510_v31 = vpack.c.bf16 %v1331_v30, %v1330_v49  ;;  %v5606_v50 = vpack.c.bf16 %v2249_v8, %v2248_v34  ;;  %v2251_v30 = vld [vmem:[#allocation8 + $0x2e8] sm:$0xff]  ;;  %v6987_v49 = vld [vmem:[#allocation2 + $0xc0] sm:$0xff]  ;;  %v2253_v8 = vld [vmem:[#allocation8 + $0x2f8] sm:$0xff] }
 0x1d6   : > { %4955 = vmatprep.mubr.f32.mxu1 %v6761_v40  ;;  %5597 = vmatpush3.bf16.msra.mxu1 %v5594_v63  ;;  %v1332_v40 = vld [vmem:[#allocation8 + $0x160] sm:$0xff]  ;;  %v1333_v63 = vld [vmem:[#allocation8 + $0x168] sm:$0xff] }
 0x1d7   : > { %4724 = vmatprep.mubr.f32.mxu0 %v6972_v32  ;;  %5599 = vmatprep.subr.bf16.mxu1 %v5598_v17 }
 0x1d8   : > { %5507 = vmatprep.subr.bf16.mxu0 %v5506_v62 }
 0x1d9   : > { %4956 = vmatmul.mubr.f32.gmra.mrb[22].mxu1 %v6758_v39  ;;  %4725 = vmatmul.mubr.f32.gmra.mrb[44].mxu0 %v6975_v43  ;;  %v5514_v39 = vpack.c.bf16 %v1333_v63, %v1332_v40  ;;  %v1334_v43 = vld [vmem:[#allocation8 + $0x170] sm:$0xff]  ;;  %v2557_v63 = vld [vmem:[#allocation8 + $0x360] sm:$0xff] }
 0x1da   : > { %4958 = vmatprep.mubr.f32.mxu1 %v6771_v47  ;;  %4727 = vmatprep.mubr.f32.mxu0 %v6979_v33  ;;  %v1335_v47 = vld [vmem:[#allocation8 + $0x178] sm:$0xff] }
 0x1db   : > { %5601 = vmatpush3.bf16.msra.mxu1 %v5598_v17  ;;  %5509 = vmatpush3.bf16.msra.mxu0 %v5506_v62  ;;  %v6991_v17 = vld [vmem:[#allocation2 + $0xc8] sm:$0xff]  ;;  %v5610_v62 = vpack.c.bf16 %v2251_v30, %v2250_v22  ;;  %v5518_v34 = vpack.c.bf16 %v1335_v47, %v1334_v43  ;;  %v2545_v43 = vld [vmem:[#allocation8 + $0x300] sm:$0xff]  ;;  %v7097_v47 = vld [vmem:[#allocation2 + $0xda] sm:$0xff] }
 0x1dc   : > { %5603 = vmatprep.subr.bf16.mxu1 %v5602_v14  ;;  %5511 = vmatprep.subr.bf16.mxu0 %v5510_v31  ;;  %v7087_v40 = vld [vmem:[#allocation2 + $0xc2] sm:$0xff]  ;;  %v7092_v30 = vld [vmem:[#allocation2 + $0xca] sm:$0xff] }
 0x1dd   : > { %4959 = vmatmul.mubr.f32.gmra.mrb[24].mxu1 %v6768_v46  ;;  %4728 = vmatmul.mubr.f32.gmra.mrb[46].mxu0 %v6983_v15  ;;  %v2252_v46 = vld [vmem:[#allocation8 + $0x2f0] sm:$0xff]  ;;  %v7538_v22 = vld [vmem:[#allocation20_spill] sm:$0xff] }
 0x1de   : > { %4961 = vmatprep.mubr.f32.mxu1 %v6781_v54  ;;  %4730 = vmatprep.mubr.f32.mxu0 %v6987_v49  ;;  %v5614_v54 = vpack.c.bf16 %v2253_v8, %v2252_v46  ;;  %v7539_v46 = vld [vmem:[#allocation21_spill] sm:$0xff]  ;;  %v7102_v8 = vld [vmem:[#allocation2 + $0xe2] sm:$0xff] }
 0x1df   : > { %5605 = vmatpush3.bf16.msra.mxu1 %v5602_v14  ;;  %5513 = vmatpush3.bf16.msra.mxu0 %v5510_v31  ;;  %v2546_v14 = vld [vmem:[#allocation8 + $0x308] sm:$0xff] }
 0x1e0   : > { %5607 = vmatprep.subr.bf16.mxu1 %v5606_v50  ;;  %5515 = vmatprep.subr.bf16.mxu0 %v5514_v39 }
 0x1e1   : > { %4962 = vmatmul.mubr.f32.gmra.mrb[26].mxu1 %v6778_v53  ;;  %4731 = vmatmul.mubr.f32.gmra.mrb[48].mxu0 %v6991_v17  ;;  %v5618_v53 = vpack.c.bf16 %v2546_v14, %v2545_v43  ;;  %v7107_v43 = vld [vmem:[#allocation2 + $0xf2] sm:$0xff] }
 0x1e2   : > { %4964 = vmatprep.mubr.f32.mxu1 %v6791_v61  ;;  %4733 = vmatprep.mubr.f32.mxu0 %v6835_v45  ;;  %v1288_v61 = vld [vmem:[#allocation2 + $0xa] sm:$0xff] }
 0x1e3   : > { %5609 = vmatpush3.bf16.msra.mxu1 %v5606_v50  ;;  %5517 = vmatpush3.bf16.msra.mxu0 %v5514_v39  ;;  %v7042_v45 = vld [vmem:[#allocation2 + $0x4a] sm:$0xff]  ;;  %v2558_v50 = vld [vmem:[#allocation8 + $0x368] sm:$0xff] }
 0x1e4   : > { %5611 = vmatprep.subr.bf16.mxu1 %v5610_v62  ;;  %5519 = vmatprep.subr.bf16.mxu0 %v5518_v34  ;;  %v5642_v39 = vpack.c.bf16 %v2558_v50, %v2557_v63  ;;  %v2851_v14 = vld [vmem:[#allocation8 + $0x380] sm:$0xff]  ;;  %v2860_v63 = vld [vmem:[#allocation8 + $0x3c8] sm:$0xff]  ;;  %v2862_v50 = vld [vmem:[#allocation8 + $0x3d8] sm:$0xff] }
 0x1e5   : > { %4965 = vmatmul.mubr.f32.gmra.mrb[28].mxu1 %v6788_v60  ;;  %4734 = vmatmul.mubr.f32.gmra.mrb[50].mxu0 %v6837_v48  ;;  %v1287_v60 = vld [vmem:[#allocation2 + $0x2] sm:$0xff] }
 0x1e6   : > { %4967 = vmatprep.mubr.f32.mxu1 %v6801_v3  ;;  %4736 = vmatprep.mubr.f32.mxu0 %v6852_v0  ;;  %v1290_v3 = vld [vmem:[#allocation2 + $0x22] sm:$0xff]  ;;  %v7535_v0 = vld [vmem:[#allocation17_spill] sm:$0xff] }
 0x1e7   : > { %5613 = vmatpush3.bf16.msra.mxu1 %v5610_v62  ;;  %5521 = vmatpush3.bf16.msra.mxu0 %v5518_v34  ;;  %v2559_v62 = vld [vmem:[#allocation8 + $0x370] sm:$0xff]  ;;  %v2560_v34 = vld [vmem:[#allocation8 + $0x378] sm:$0xff] }
 0x1e8   : > { %5615 = vmatprep.subr.bf16.mxu1 %v5614_v54  ;;  %5523 = vmatprep.subr.bf16.mxu0 %v6684_v21 }
 0x1e9   : > { %4968 = vmatmul.mubr.f32.gmra.mrb[30].mxu1 %v6798_v2  ;;  %4737 = vmatmul.mubr.f32.gmra.mrb[52].mxu0 %v6854_v1  ;;  %v1289_v2 = vld [vmem:[#allocation2 + $0x1a] sm:$0xff]  ;;  %v7051_v1 = vld [vmem:[#allocation2 + $0x62] sm:$0xff] }
 0x1ea   : > { %4970 = vmatprep.mubr.f32.mxu1 %v6811_v11  ;;  %4739 = vmatprep.mubr.f32.mxu0 %v6868_v25  ;;  %v7532_v11 = vmax.f32 %v6908_v35, 0.0  ;;  %v2552_v25 = vld [vmem:[#allocation8 + $0x338] sm:$0xff] }
 0x1eb   : > { %5617 = vmatpush3.bf16.msra.mxu1 %v5614_v54  ;;  %v7077_v35 = vld [vmem:[#allocation2 + $0xaa] sm:$0xff]  ;;  %v5646_v54 = vpack.c.bf16 %v2560_v34, %v2559_v62  ;;  %v2865_v62 = vld [vmem:[#allocation8 + $0x3f0] sm:$0xff] }
 0x1ec   : > { %5619 = vmatprep.subr.bf16.mxu1 %v5618_v53 }
 0x1ed   : > { %4971 = vmatmul.mubr.f32.gmra.mrb[0].mxu1 %v6808_v10  ;;  %4740 = vmatmul.mubr.f32.gmra.mrb[54].mxu0 %v6870_v26  ;;  %v7030_v10 = vld [vmem:[#allocation2 + $0x32] sm:$0xff]  ;;  %v7060_v26 = vld [vmem:[#allocation2 + $0x7a] sm:$0xff] }
 0x1ee   : > { %4973 = vmatprep.mubr.f32.mxu1 %v6821_v20  ;;  %4742 = vmatprep.mubr.f32.mxu0 %v6884_v52  ;;  %v2547_v20 = vld [vmem:[#allocation8 + $0x310] sm:$0xff]  ;;  %v7536_v52 = vld [vmem:[#allocation18_spill] sm:$0xff] }
 0x1f1   : > { %4974 = vmatmul.mubr.f32.gmra.mrb[2].mxu1 %v6818_v19  ;;  %4743 = vmatmul.mubr.f32.gmra.mrb[56].mxu0 %v6886_v56  ;;  %v7036_v19 = vld [vmem:[#allocation2 + $0x3a] sm:$0xff]  ;;  %v2553_v56 = vld [vmem:[#allocation8 + $0x340] sm:$0xff] }
 0x1f2   : > { %4976 = vmatprep.mubr.f32.mxu1 %v6831_v38  ;;  %4745 = vmatprep.mubr.f32.mxu0 %v6902_v18  ;;  %v7072_v18 = vld [vmem:[#allocation2 + $0x9a] sm:$0xff] }
 0x1f5   : > { %4977 = vmatmul.mubr.f32.gmra.mrb[4].mxu1 %v6828_v36  ;;  %4746 = vmatmul.mubr.f32.gmra.mrb[58].mxu0 %v6904_v29  ;;  %v2548_v36 = vld [vmem:[#allocation8 + $0x318] sm:$0xff] }
 0x1f6   : > { %4979 = vmatprep.mubr.f32.mxu1 %v6847_v58  ;;  %4748 = vmatprep.mubr.f32.mxu0 %v6919_v9  ;;  %v5622_v48 = vpack.c.bf16 %v2548_v36, %v2547_v20  ;;  %v2550_v58 = vld [vmem:[#allocation8 + $0x328] sm:$0xff]  ;;  %v2555_v9 = vld [vmem:[#allocation8 + $0x350] sm:$0xff]  ;;  %v7127_v20 = vld [vmem:[#allocation2 + $0x12a] sm:$0xff] }
 0x1f7   : > { %v7131_v36 = vld [vmem:[#allocation2 + $0x13a] sm:$0xff] }
 0x1f9   : > { %4980 = vmatmul.mubr.f32.gmra.mrb[6].mxu1 %v6843_v57  ;;  %4749 = vmatmul.mubr.f32.gmra.mrb[60].mxu0 %v6921_v4  ;;  %v2549_v57 = vld [vmem:[#allocation8 + $0x320] sm:$0xff]  ;;  %v2556_v4 = vld [vmem:[#allocation8 + $0x358] sm:$0xff] }
 0x1fa   : > { %4982 = vmatprep.mubr.f32.mxu1 %v6864_v12  ;;  %4751 = vmatprep.mubr.f32.mxu0 %v6931_v28  ;;  %v7054_v12 = vld [vmem:[#allocation2 + $0x6a] sm:$0xff]  ;;  %v7537_v28 = vld [vmem:[#allocation19_spill] sm:$0xff]  ;;  %v5638_v31 = vpack.c.bf16 %v2556_v4, %v2555_v9 }
 0x1fb   : > { %v2857_v4 = vld [vmem:[#allocation8 + $0x3b0] sm:$0xff] }
 0x1fd   : > { %4983 = vmatmul.mubr.f32.gmra.mrb[8].mxu1 %v6860_v7  ;;  %4752 = vmatmul.mubr.f32.gmra.mrb[62].mxu0 %v6933_v44  ;;  %v5626_v7 = vpack.c.bf16 %v2550_v58, %v2549_v57  ;;  %v7082_v44 = vld [vmem:[#allocation2 + $0xb2] sm:$0xff]  ;;  %v7147_v57 = vld [vmem:[#allocation2 + $0x16a] sm:$0xff] }
 0x1fe   : > { %4985 = vmatprep.mubr.f32.mxu1 %v6880_v42  ;;  %4786 = vmatprep.mubr.f32.mxu0 %v1287_v60  ;;  %v7063_v42 = vld [vmem:[#allocation2 + $0x82] sm:$0xff]  ;;  %v7111_v60 = vld [vmem:[#allocation2 + $0xfa] sm:$0xff]  ;;  %v7151_v58 = vld [vmem:[#allocation2 + $0x172] sm:$0xff] }
 0x201   : > { %4986 = vmatmul.mubr.f32.gmra.mrb[10].mxu1 %v6876_v41  ;;  %4787 = vmatmul.mubr.f32.vlgmr.msra.gmra.mrb[32].mxu0 %v1288_v61 }
 0x202   : > { %4988 = vmatprep.mubr.f32.mxu1 %v6896_v55  ;;  %4789 = vmatprep.mubr.f32.mxu0 %v1289_v2  ;;  %v7069_v55 = vld [vmem:[#allocation2 + $0x92] sm:$0xff] }
 0x203   : > { %5525 = vmatpush3.bf16.msra.mxu0 %v6684_v21  ;;  %v7533_v21 = vld [vmem:[#allocation22_spill] sm:$0xff] }
 0x204   : > { %5527 = vmatprep.subr.bf16.mxu0 %v6688_v24  ;;  %v7534_v38 = vmax.f32 %v7533_v21, 0.0  ;;  %v7135_v21 = vld [vmem:[#allocation2 + $0x142] sm:$0xff] }
 0x205   : > { %4989 = vmatmul.mubr.f32.gmra.mrb[12].mxu1 %v6892_v5  ;;  %4790 = vmatmul.mubr.f32.gmra.mrb[34].mxu0 %v1290_v3  ;;  %v2554_v5 = vld [vmem:[#allocation8 + $0x348] sm:$0xff] }
 0x206   : > { %4991 = vmatprep.mubr.f32.mxu1 %v7532_v11  ;;  %4792 = vmatprep.mubr.f32.mxu0 %v7030_v10  ;;  %v5634_v29 = vpack.c.bf16 %v2554_v5, %v2553_v56  ;;  %v7123_v11 = vld [vmem:[#allocation2 + $0x122] sm:$0xff]  ;;  %v2855_v56 = vld [vmem:[#allocation8 + $0x3a0] sm:$0xff]  ;;  %v2856_v5 = vld [vmem:[#allocation8 + $0x3a8] sm:$0xff] }
 0x207   : > { %5529 = vmatpush3.bf16.msra.mxu0 %v6688_v24  ;;  %v7046_v24 = vld [vmem:[#allocation2 + $0x52] sm:$0xff]  ;;  %v5658_v9 = vpack.c.bf16 %v2856_v5, %v2855_v56  ;;  %v2538_v5 = vld [vmem:[#allocation2 + $0x168] sm:$0xff] }
 0x208   : > { %5531 = vmatprep.subr.bf16.mxu0 %v6692_v27  ;;  %v2537_v56 = vld [vmem:[#allocation2 + $0x158] sm:$0xff] }
 0x209   : > { %4992 = vmatmul.mubr.f32.gmra.mrb[14].mxu1 %v7534_v38  ;;  %4793 = vmatmul.mubr.f32.gmra.mrb[36].mxu0 %v7036_v19  ;;  %v7139_v38 = vld [vmem:[#allocation2 + $0x152] sm:$0xff] }
 0x20a   : > { %5026 = vmatprep.mubr.f32.mxu1 %v1289_v2  ;;  %4795 = vmatprep.mubr.f32.mxu0 %v7042_v45  ;;  %v7115_v2 = vld [vmem:[#allocation2 + $0x10a] sm:$0xff] }
 0x20b   : > { %5533 = vmatpush3.bf16.msra.mxu0 %v6692_v27  ;;  %v2551_v27 = vld [vmem:[#allocation8 + $0x330] sm:$0xff] }
 0x20c   : > { %5535 = vmatprep.subr.bf16.mxu0 %v7535_v0  ;;  %v5630_v41 = vpack.c.bf16 %v2552_v25, %v2551_v27  ;;  %v7162_v27 = vld [vmem:[#allocation2 + $0x182] sm:$0xff]  ;;  %v7167_v25 = vld [vmem:[#allocation2 + $0x18a] sm:$0xff] }
 0x20d   : > { %5027 = vmatmul.mubr.f32.vlgmr.msra.gmra.mrb[16].mxu1 %v1290_v3  ;;  %4796 = vmatmul.mubr.f32.gmra.mrb[38].mxu0 %v7046_v24  ;;  %v7119_v3 = vld [vmem:[#allocation2 + $0x112] sm:$0xff] }
 0x20e   : > { %5621 = vmatpush3.bf16.msra.mxu1 %v5618_v53  ;;  %5029 = vmatprep.mubr.f32.mxu1 %v7030_v10  ;;  %v2852_v53 = vld [vmem:[#allocation8 + $0x388] sm:$0xff] }
 0x20f   : > { %5623 = vmatprep.subr.bf16.mxu1 %v5622_v48  ;;  %4798 = vmatprep.mubr.f32.mxu0 %v7051_v1  ;;  %v5650_v61 = vpack.c.bf16 %v2852_v53, %v2851_v14  ;;  %v3158_v14 = vld [vmem:[#allocation8 + $0x408] sm:$0xff] }
 0x210   : > { %5537 = vmatpush3.bf16.msra.mxu0 %v7535_v0  ;;  %v7540_v0 = vld [vmem:[#allocation23_spill] sm:$0xff] }
 0x211   : > { %5030 = vmatmul.mubr.f32.gmra.mrb[18].mxu1 %v7036_v19  ;;  %4799 = vmatmul.mubr.f32.gmra.mrb[40].mxu0 %v7054_v12 }
 0x212   : > { %5032 = vmatprep.mubr.f32.mxu1 %v7042_v45  ;;  %5625 = vmatpush3.bf16.msra.mxu1 %v5622_v48  ;;  %v7143_v48 = vld [vmem:[#allocation2 + $0x15a] sm:$0xff] }
 0x213   : > { %4801 = vmatprep.mubr.f32.mxu0 %v7060_v26  ;;  %5627 = vmatprep.subr.bf16.mxu1 %v5626_v7 }
 0x214   : > { %5539 = vmatprep.subr.bf16.mxu0 %v7536_v52 }
 0x215   : > { %5033 = vmatmul.mubr.f32.gmra.mrb[20].mxu1 %v7046_v24  ;;  %4802 = vmatmul.mubr.f32.gmra.mrb[42].mxu0 %v7063_v42 }
 0x216   : > { %5035 = vmatprep.mubr.f32.mxu1 %v7051_v1  ;;  %5629 = vmatpush3.bf16.msra.mxu1 %v5626_v7  ;;  %v7541_v7 = vld [vmem:[#allocation24_spill] sm:$0xff] }
 0x217   : > { %4804 = vmatprep.mubr.f32.mxu0 %v7069_v55  ;;  %5631 = vmatprep.subr.bf16.mxu1 %v5630_v41 }
 0x218   : > { %5541 = vmatpush3.bf16.msra.mxu0 %v7536_v52  ;;  %v2854_v52 = vld [vmem:[#allocation8 + $0x398] sm:$0xff] }
 0x219   : > { %5036 = vmatmul.mubr.f32.gmra.mrb[22].mxu1 %v7054_v12  ;;  %4805 = vmatmul.mubr.f32.gmra.mrb[44].mxu0 %v7072_v18 }
 0x21a   : > { %5038 = vmatprep.mubr.f32.mxu1 %v7060_v26  ;;  %4807 = vmatprep.mubr.f32.mxu0 %v7077_v35 }
 0x21b   : > { %5633 = vmatpush3.bf16.msra.mxu1 %v5630_v41  ;;  %5543 = vmatprep.subr.bf16.mxu0 %v7537_v28  ;;  %v2853_v41 = vld [vmem:[#allocation8 + $0x390] sm:$0xff] }
 0x21c   : > { %5635 = vmatprep.subr.bf16.mxu1 %v5634_v29  ;;  %5545 = vmatpush3.bf16.msra.mxu0 %v7537_v28  ;;  %v2858_v28 = vld [vmem:[#allocation8 + $0x3b8] sm:$0xff] }
 0x21d   : > { %5039 = vmatmul.mubr.f32.gmra.mrb[24].mxu1 %v7063_v42  ;;  %4808 = vmatmul.mubr.f32.gmra.mrb[46].mxu0 %v7082_v44 }
 0x21e   : > { %5041 = vmatprep.mubr.f32.mxu1 %v7069_v55  ;;  %4810 = vmatprep.mubr.f32.mxu0 %v7087_v40 }
 0x21f   : > { %5637 = vmatpush3.bf16.msra.mxu1 %v5634_v29  ;;  %5547 = vmatprep.subr.bf16.mxu0 %v7538_v22  ;;  %v7542_v29 = vld [vmem:[#allocation25_spill] sm:$0xff] }
 0x220   : > { %5639 = vmatprep.subr.bf16.mxu1 %v5638_v31  ;;  %5549 = vmatpush3.bf16.msra.mxu0 %v7538_v22 }
 0x221   : > { %5042 = vmatmul.mubr.f32.gmra.mrb[26].mxu1 %v7072_v18  ;;  %4811 = vmatmul.mubr.f32.gmra.mrb[48].mxu0 %v7092_v30 }
 0x222   : > { %5044 = vmatprep.mubr.f32.mxu1 %v7077_v35  ;;  %4813 = vmatprep.mubr.f32.mxu0 %v7097_v47 }
 0x223   : > { %5641 = vmatpush3.bf16.msra.mxu1 %v5638_v31  ;;  %5551 = vmatprep.subr.bf16.mxu0 %v7539_v46  ;;  %v2859_v31 = vld [vmem:[#allocation8 + $0x3c0] sm:$0xff] }
 0x224   : > { %5643 = vmatprep.subr.bf16.mxu1 %v5642_v39  ;;  %5553 = vmatpush3.bf16.msra.mxu0 %v7539_v46  ;;  %v2526_v46 = vld [vmem:[#allocation2 + $0xd8] sm:$0xff] }
 0x225   : > { %5045 = vmatmul.mubr.f32.gmra.mrb[28].mxu1 %v7082_v44  ;;  %4814 = vmatmul.mubr.f32.gmra.mrb[50].mxu0 %v7102_v8 }
 0x226   : > { %5047 = vmatprep.mubr.f32.mxu1 %v7087_v40  ;;  %4816 = vmatprep.mubr.f32.mxu0 %v7107_v43 }
 0x227   : > { %5645 = vmatpush3.bf16.msra.mxu1 %v5642_v39  ;;  %v2864_v39 = vld [vmem:[#allocation8 + $0x3e8] sm:$0xff] }
 0x228   : > { %5647 = vmatprep.subr.bf16.mxu1 %v5646_v54 }
 0x229   : > { %5048 = vmatmul.mubr.f32.gmra.mrb[30].mxu1 %v7092_v30  ;;  %4817 = vmatmul.mubr.f32.gmra.mrb[52].mxu0 %v7111_v60 }
 0x22a   : > { %5050 = vmatprep.mubr.f32.mxu1 %v7097_v47  ;;  %4819 = vmatprep.mubr.f32.mxu0 %v7115_v2 }
 0x22b   : > { %5649 = vmatpush3.bf16.msra.mxu1 %v5646_v54  ;;  %v3157_v54 = vld [vmem:[#allocation8 + $0x400] sm:$0xff] }
 0x22c   : > { %5651 = vmatprep.subr.bf16.mxu1 %v5650_v61  ;;  %v5682_v53 = vpack.c.bf16 %v3158_v14, %v3157_v54  ;;  %v3165_v54 = vld [vmem:[#allocation8 + $0x440] sm:$0xff]  ;;  %v3166_v14 = vld [vmem:[#allocation8 + $0x448] sm:$0xff] }
 0x22d   : > { %5051 = vmatmul.mubr.f32.gmra.mrb[0].mxu1 %v7102_v8  ;;  %4820 = vmatmul.mubr.f32.gmra.mrb[54].mxu0 %v7119_v3 }
 0x22e   : > { %5053 = vmatprep.mubr.f32.mxu1 %v7107_v43  ;;  %4822 = vmatprep.mubr.f32.mxu0 %v7123_v11 }
 0x231   : > { %5054 = vmatmul.mubr.f32.gmra.mrb[2].mxu1 %v7111_v60  ;;  %4823 = vmatmul.mubr.f32.gmra.mrb[56].mxu0 %v7127_v20 }
 0x232   : > { %5056 = vmatprep.mubr.f32.mxu1 %v7115_v2  ;;  %4825 = vmatprep.mubr.f32.mxu0 %v7131_v36 }
 0x235   : > { %5057 = vmatmul.mubr.f32.gmra.mrb[4].mxu1 %v7119_v3  ;;  %4826 = vmatmul.mubr.f32.gmra.mrb[58].mxu0 %v7135_v21 }
 0x236   : > { %5059 = vmatprep.mubr.f32.mxu1 %v7123_v11  ;;  %4828 = vmatprep.mubr.f32.mxu0 %v7139_v38 }
 0x239   : > { %5060 = vmatmul.mubr.f32.gmra.mrb[6].mxu1 %v7127_v20  ;;  %4829 = vmatmul.mubr.f32.gmra.mrb[60].mxu0 %v7143_v48 }
 0x23a   : > { %5062 = vmatprep.mubr.f32.mxu1 %v7131_v36  ;;  %4831 = vmatprep.mubr.f32.mxu0 %v7147_v57 }
 0x23d   : > { %5063 = vmatmul.mubr.f32.gmra.mrb[8].mxu1 %v7135_v21  ;;  %4832 = vmatmul.mubr.f32.gmra.mrb[62].mxu0 %v7151_v58 }
 0x23e   : > { %5065 = vmatprep.mubr.f32.mxu1 %v7139_v38  ;;  %4866 = vmatprep.mubr.f32.mxu0 %v7540_v0  ;;  %v2531_v0 = vld [vmem:[#allocation2 + $0x110] sm:$0xff] }
 0x241   : > { %5066 = vmatmul.mubr.f32.gmra.mrb[10].mxu1 %v7143_v48  ;;  %4867 = vmatmul.mubr.f32.vlgmr.msra.gmra.mrb[32].mxu0 %v6937_v13  ;;  %v5654_v13 = vpack.c.bf16 %v2854_v52, %v2853_v41  ;;  %v2534_v41 = vld [vmem:[#allocation2 + $0x138] sm:$0xff]  ;;  %v2535_v52 = vld [vmem:[#allocation2 + $0x140] sm:$0xff] }
 0x242   : > { %5068 = vmatprep.mubr.f32.mxu1 %v7147_v57  ;;  %4869 = vmatprep.mubr.f32.mxu0 %v7541_v7 }
 0x245   : > { %5069 = vmatmul.mubr.f32.gmra.mrb[12].mxu1 %v7151_v58  ;;  %4870 = vmatmul.mubr.f32.gmra.mrb[34].mxu0 %v6944_v59 }
 0x246   : > { %5071 = vmatprep.mubr.f32.mxu1 %v7162_v27  ;;  %4872 = vmatprep.mubr.f32.mxu0 %v6948_v6 }
 0x249   : > { %5072 = vmatmul.mubr.f32.gmra.mrb[14].mxu1 %v7167_v25  ;;  %4873 = vmatmul.mubr.f32.gmra.mrb[36].mxu0 %v6951_v51 }
 0x24a   : > { %5106 = vmatprep.mubr.f32.mxu1 %v7541_v7  ;;  %4875 = vmatprep.mubr.f32.mxu0 %v6956_v16  ;;  %v2533_v7 = vld [vmem:[#allocation2 + $0x128] sm:$0xff] }
 0x24d   : > { %5107 = vmatmul.mubr.f32.vlgmr.msra.gmra.mrb[16].mxu1 %v6944_v59  ;;  %4876 = vmatmul.mubr.f32.gmra.mrb[38].mxu0 %v7542_v29  ;;  %v5662_v59 = vpack.c.bf16 %v2858_v28, %v2857_v4  ;;  %v2541_v4 = vld [vmem:[#allocation2 + $0x188] sm:$0xff]  ;;  %v6100_v28 = vld [vmem:[#allocation2] sm:$0xff] }
 0x24e   : > { %5653 = vmatpush3.bf16.msra.mxu1 %v5650_v61  ;;  %5109 = vmatprep.mubr.f32.mxu1 %v6948_v6  ;;  %v7543_v6 = vld [vmem:[#allocation26_spill] sm:$0xff]  ;;  %v2528_v61 = vld [vmem:[#allocation2 + $0xf0] sm:$0xff] }
 0x24f   : > { %5655 = vmatprep.subr.bf16.mxu1 %v5654_v13  ;;  %4878 = vmatprep.mubr.f32.mxu0 %v6964_v23 }
 0x251   : > { %5110 = vmatmul.mubr.f32.gmra.mrb[18].mxu1 %v6951_v51  ;;  %4879 = vmatmul.mubr.f32.gmra.mrb[40].mxu0 %v6967_v37  ;;  %v5666_v51 = vpack.c.bf16 %v2860_v63, %v2859_v31  ;;  %v2818_v31 = vld [vmem:[#allocation2 + $0x31] sm:$0xff] }
 0x252   : > { %5112 = vmatprep.mubr.f32.mxu1 %v6956_v16  ;;  %5657 = vmatpush3.bf16.msra.mxu1 %v5654_v13  ;;  %v2861_v16 = vld [vmem:[#allocation8 + $0x3d0] sm:$0xff]  ;;  %v2536_v13 = vld [vmem:[#allocation2 + $0x150] sm:$0xff] }
 0x253   : > { %4881 = vmatprep.mubr.f32.mxu0 %v6972_v32  ;;  %5659 = vmatprep.subr.bf16.mxu1 %v5658_v9  ;;  %v5670_v22 = vpack.c.bf16 %v2862_v50, %v2861_v16  ;;  %v3161_v16 = vld [vmem:[#allocation8 + $0x420] sm:$0xff]  ;;  %v3162_v50 = vld [vmem:[#allocation8 + $0x428] sm:$0xff] }
 0x255   : > { %5113 = vmatmul.mubr.f32.gmra.mrb[20].mxu1 %v7542_v29  ;;  %4882 = vmatmul.mubr.f32.gmra.mrb[42].mxu0 %v7543_v6  ;;  %v2539_v29 = vld [vmem:[#allocation2 + $0x170] sm:$0xff] }
 0x256   : > { %5115 = vmatprep.mubr.f32.mxu1 %v6964_v23  ;;  %5661 = vmatpush3.bf16.msra.mxu1 %v5658_v9  ;;  %v2863_v23 = vld [vmem:[#allocation8 + $0x3e0] sm:$0xff]  ;;  %v2540_v9 = vld [vmem:[#allocation2 + $0x180] sm:$0xff] }
 0x257   : > { %4884 = vmatprep.mubr.f32.mxu0 %v6979_v33  ;;  %5663 = vmatprep.subr.bf16.mxu1 %v5662_v59 }
 0x259   : > { %5116 = vmatmul.mubr.f32.gmra.mrb[22].mxu1 %v6967_v37  ;;  %4885 = vmatmul.mubr.f32.gmra.mrb[44].mxu0 %v6983_v15  ;;  %v5674_v37 = vpack.c.bf16 %v2864_v39, %v2863_v23  ;;  %v5690_v23 = vpack.c.bf16 %v3162_v50, %v3161_v16  ;;  %v2821_v39 = vld [vmem:[#allocation2 + $0x51] sm:$0xff]  ;;  %v2836_v16 = vld [vmem:[#allocation2 + $0x109] sm:$0xff] }
 0x25a   : > { %5118 = vmatprep.mubr.f32.mxu1 %v6972_v32  ;;  %4887 = vmatprep.mubr.f32.mxu0 %v6987_v49  ;;  %v2866_v32 = vld [vmem:[#allocation8 + $0x3f8] sm:$0xff]  ;;  %v2837_v50 = vld [vmem:[#allocation2 + $0x111] sm:$0xff] }
 0x25b   : > { %5665 = vmatpush3.bf16.msra.mxu1 %v5662_v59  ;;  %v5678_v34 = vpack.c.bf16 %v2866_v32, %v2865_v62  ;;  %v3159_v59 = vld [vmem:[#allocation8 + $0x410] sm:$0xff]  ;;  %v3164_v62 = vld [vmem:[#allocation8 + $0x438] sm:$0xff] }
 0x25c   : > { %5667 = vmatprep.subr.bf16.mxu1 %v5666_v51  ;;  %v2822_v32 = vld [vmem:[#allocation2 + $0x61] sm:$0xff] }
 0x25d   : > { %5119 = vmatmul.mubr.f32.gmra.mrb[24].mxu1 %v7543_v6  ;;  %4888 = vmatmul.mubr.f32.gmra.mrb[46].mxu0 %v6991_v17  ;;  %v3160_v6 = vld [vmem:[#allocation8 + $0x418] sm:$0xff] }
 0x25e   : > { %5121 = vmatprep.mubr.f32.mxu1 %v6979_v33  ;;  %v2527_v33 = vld [vmem:[#allocation2 + $0xe0] sm:$0xff]  ;;  %v5686_v63 = vpack.c.bf16 %v3160_v6, %v3159_v59  ;;  %v2831_v59 = vld [vmem:[#allocation2 + $0xc9] sm:$0xff] }
 0x25f   : > { %5669 = vmatpush3.bf16.msra.mxu1 %v5666_v51  ;;  %v2819_v51 = vld [vmem:[#allocation2 + $0x39] sm:$0xff] }
 0x260   : > { %5671 = vmatprep.subr.bf16.mxu1 %v5670_v22  ;;  %v2832_v6 = vld [vmem:[#allocation2 + $0xd9] sm:$0xff] }
 0x261   : > { %5122 = vmatmul.mubr.f32.gmra.mrb[26].mxu1 %v6983_v15  ;;  %v2529_v15 = vld [vmem:[#allocation2 + $0xf8] sm:$0xff] }
 0x262   : > { %5124 = vmatprep.mubr.f32.mxu1 %v6987_v49  ;;  %v2530_v49 = vld [vmem:[#allocation2 + $0x108] sm:$0xff] }
 0x263   : > { %5673 = vmatpush3.bf16.msra.mxu1 %v5670_v22  ;;  %v2820_v22 = vld [vmem:[#allocation2 + $0x49] sm:$0xff] }
 0x264   : > { %5675 = vmatprep.subr.bf16.mxu1 %v5674_v37 }
 0x265   : > { %5125 = vmatmul.mubr.f32.gmra.mrb[28].mxu1 %v6991_v17  ;;  %v2532_v17 = vld [vmem:[#allocation2 + $0x120] sm:$0xff] }
 0x266   : > { %5127 = vmatprep.mubr.f32.mxu1 %v2526_v46  ;;  %v2823_v46 = vld [vmem:[#allocation2 + $0x69] sm:$0xff] }
 0x267   : > { %5677 = vmatpush3.bf16.msra.mxu1 %v5674_v37  ;;  %v3163_v37 = vld [vmem:[#allocation8 + $0x430] sm:$0xff] }
 0x268   : > { %5679 = vmatprep.subr.bf16.mxu1 %v5678_v34 }
 0x269   : > { %5128 = vmatmul.mubr.f32.gmra.mrb[30].mxu1 %v2527_v33  ;;  %v2824_v33 = vld [vmem:[#allocation2 + $0x79] sm:$0xff] }
 0x26a   : > { %5130 = vmatprep.mubr.f32.mxu1 %v2528_v61  ;;  %v2825_v61 = vld [vmem:[#allocation2 + $0x81] sm:$0xff] }
 0x26b   : > { %5681 = vmatpush3.bf16.msra.mxu1 %v5678_v34  ;;  %v5694_v34 = vpack.c.bf16 %v3164_v62, %v3163_v37  ;;  %v3503_v37 = vld [vmem:[#allocation9 + $0x10] sm:$0xff] }
 0x26c   : > { %5683 = vmatprep.subr.bf16.mxu1 %v5682_v53 }
 0x26d   : > { %5131 = vmatmul.mubr.f32.gmra.mrb[0].mxu1 %v2529_v15  ;;  %v3167_v15 = vld [vmem:[#allocation8 + $0x450] sm:$0xff] }
 0x26e   : > { %5133 = vmatprep.mubr.f32.mxu1 %v2530_v49  ;;  %v3168_v49 = vld [vmem:[#allocation8 + $0x458] sm:$0xff] }
 0x271   : > { %5134 = vmatmul.mubr.f32.gmra.mrb[2].mxu1 %v2531_v0  ;;  %v2826_v0 = vld [vmem:[#allocation2 + $0x91] sm:$0xff] }
 0x272   : > { %5136 = vmatprep.mubr.f32.mxu1 %v2532_v17  ;;  %v5702_v17 = vpack.c.bf16 %v3168_v49, %v3167_v15  ;;  %v3508_v15 = vld [vmem:[#allocation9 + $0x38] sm:$0xff] }
 0x273   : > { %v2841_v49 = vld [vmem:[#allocation2 + $0x141] sm:$0xff] }
 0x275   : > { %5137 = vmatmul.mubr.f32.gmra.mrb[4].mxu1 %v2533_v7  ;;  %v2827_v7 = vld [vmem:[#allocation2 + $0x99] sm:$0xff] }
 0x276   : > { %5139 = vmatprep.mubr.f32.mxu1 %v2534_v41  ;;  %v3169_v41 = vld [vmem:[#allocation8 + $0x460] sm:$0xff] }
 0x279   : > { %5140 = vmatmul.mubr.f32.gmra.mrb[6].mxu1 %v2535_v52  ;;  %v3170_v52 = vld [vmem:[#allocation8 + $0x468] sm:$0xff] }
 0x27a   : > { %5142 = vmatprep.mubr.f32.mxu1 %v2536_v13  ;;  %v2828_v13 = vld [vmem:[#allocation2 + $0xa9] sm:$0xff] }
 0x27d   : > { %5143 = vmatmul.mubr.f32.gmra.mrb[8].mxu1 %v2537_v56  ;;  %v5706_v56 = vpack.c.bf16 %v3170_v52, %v3169_v41  ;;  %v3510_v41 = vld [vmem:[#allocation9 + $0x48] sm:$0xff] }
 0x27e   : > { %5145 = vmatprep.mubr.f32.mxu1 %v2538_v5  ;;  %v2829_v5 = vld [vmem:[#allocation2 + $0xb1] sm:$0xff]  ;;  %v2843_v52 = vld [vmem:[#allocation2 + $0x159] sm:$0xff] }
 0x281   : > { %5146 = vmatmul.mubr.f32.gmra.mrb[10].mxu1 %v2539_v29  ;;  %v3171_v29 = vld [vmem:[#allocation8 + $0x470] sm:$0xff] }
 0x282   : > { %5148 = vmatprep.mubr.f32.mxu1 %v2540_v9  ;;  %v3172_v9 = vld [vmem:[#allocation8 + $0x478] sm:$0xff] }
 0x285   : > { %5149 = vmatmul.mubr.f32.gmra.mrb[12].mxu1 %v2541_v4  ;;  %v2830_v4 = vld [vmem:[#allocation2 + $0xc1] sm:$0xff] }
 0x286   : > { %5151 = vmatprep.mubr.f32.mxu1 %v6100_v28 }
 0x289   : > { %5152 = vmatmul.mubr.f32.gmra.mrb[14].mxu1 %v6100_v28  ;;  %v5710_v28 = vpack.c.bf16 %v3172_v9, %v3171_v29  ;;  %v3512_v29 = vld [vmem:[#allocation9 + $0x58] sm:$0xff]  ;;  %v2845_v9 = vld [vmem:[#allocation2 + $0x171] sm:$0xff] }
 0x28a   : > { %5186 = vmatprep.mubr.f32.mxu1 %v2818_v31  ;;  %v2833_v31 = vld [vmem:[#allocation2 + $0xe1] sm:$0xff] }
 0x28d   : > { %5187 = vmatmul.mubr.f32.vlgmr.msra.gmra.mrb[16].mxu1 %v2819_v51  ;;  %v2835_v51 = vld [vmem:[#allocation2 + $0xf9] sm:$0xff] }
 0x28e   : > { %5685 = vmatpush3.bf16.msra.mxu1 %v5682_v53  ;;  %5189 = vmatprep.mubr.f32.mxu1 %v2820_v22  ;;  %v5698_v53 = vpack.c.bf16 %v3166_v14, %v3165_v54  ;;  %v2838_v22 = vld [vmem:[#allocation2 + $0x121] sm:$0xff]  ;;  %v3506_v54 = vld [vmem:[#allocation9 + $0x28] sm:$0xff]  ;;  %v2839_v14 = vld [vmem:[#allocation2 + $0x129] sm:$0xff] }
 0x28f   : > { %5687 = vmatprep.subr.bf16.mxu1 %v5686_v63 }
 0x291   : > { %5190 = vmatmul.mubr.f32.gmra.mrb[18].mxu1 %v2821_v39  ;;  %v3502_v39 = vld [vmem:[#allocation9 + $0x8] sm:$0xff] }
 0x292   : > { %5192 = vmatprep.mubr.f32.mxu1 %v2822_v32  ;;  %5689 = vmatpush3.bf16.msra.mxu1 %v5686_v63  ;;  %v2834_v63 = vld [vmem:[#allocation2 + $0xf1] sm:$0xff]  ;;  %v3504_v32 = vld [vmem:[#allocation9 + $0x18] sm:$0xff] }
 0x293   : > { %5691 = vmatprep.subr.bf16.mxu1 %v5690_v23 }
 0x295   : > { %5193 = vmatmul.mubr.f32.gmra.mrb[20].mxu1 %v2823_v46  ;;  %v3505_v46 = vld [vmem:[#allocation9 + $0x20] sm:$0xff] }
 0x296   : > { %5195 = vmatprep.mubr.f32.mxu1 %v2824_v33  ;;  %5693 = vmatpush3.bf16.msra.mxu1 %v5690_v23  ;;  %v3501_v23 = vld [vmem:[#allocation9] sm:$0xff]  ;;  %v2840_v33 = vld [vmem:[#allocation2 + $0x139] sm:$0xff] }
 0x297   : > { %5695 = vmatprep.subr.bf16.mxu1 %v5694_v34  ;;  %v5714_v62 = vpack.c.bf16 %v3502_v39, %v3501_v23 }
 0x299   : > { %5196 = vmatmul.mubr.f32.gmra.mrb[22].mxu1 %v2825_v61  ;;  %5715 = vmatprep.subr.bf16.mxu0 %v5714_v62  ;;  %v3507_v61 = vld [vmem:[#allocation9 + $0x30] sm:$0xff] }
 0x29a   : > { %5198 = vmatprep.mubr.f32.mxu1 %v2826_v0  ;;  %5697 = vmatpush3.bf16.msra.mxu1 %v5694_v34  ;;  %v5718_v34 = vpack.c.bf16 %v3504_v32, %v3503_v37  ;;  %v2842_v0 = vld [vmem:[#allocation2 + $0x151] sm:$0xff] }
 0x29b   : > { %5699 = vmatprep.subr.bf16.mxu1 %v5698_v53  ;;  %5717 = vmatpush3.bf16.msra.mxu0 %v5714_v62 }
 0x29c   : > { %5719 = vmatprep.subr.bf16.mxu0 %v5718_v34 }
 0x29d   : > { %5199 = vmatmul.mubr.f32.gmra.mrb[24].mxu1 %v2827_v7  ;;  %v3509_v7 = vld [vmem:[#allocation9 + $0x40] sm:$0xff] }
 0x29e   : > { %5201 = vmatprep.mubr.f32.mxu1 %v2828_v13  ;;  %5701 = vmatpush3.bf16.msra.mxu1 %v5698_v53  ;;  %v5722_v53 = vpack.c.bf16 %v3506_v54, %v3505_v46  ;;  %v2844_v13 = vld [vmem:[#allocation2 + $0x169] sm:$0xff]  ;;  %v7266_v46 = vld [vmem:[%s7479_s4] ss:$0 sm:$0xff] }
 0x29f   : > { %5703 = vmatprep.subr.bf16.mxu1 %v5702_v17  ;;  %5721 = vmatpush3.bf16.msra.mxu0 %v5718_v34 }
 0x2a0   : > { %5723 = vmatprep.subr.bf16.mxu0 %v5722_v53 }
 0x2a1   : > { %5202 = vmatmul.mubr.f32.gmra.mrb[26].mxu1 %v2829_v5  ;;  %v3511_v5 = vld [vmem:[#allocation9 + $0x50] sm:$0xff] }
 0x2a2   : > { %5204 = vmatprep.mubr.f32.mxu1 %v2830_v4  ;;  %5705 = vmatpush3.bf16.msra.mxu1 %v5702_v17  ;;  %v5726_v17 = vpack.c.bf16 %v3508_v15, %v3507_v61  ;;  %v2846_v4 = vld [vmem:[#allocation2 + $0x181] sm:$0xff] }
 0x2a3   : > { %5707 = vmatprep.subr.bf16.mxu1 %v5706_v56  ;;  %5725 = vmatpush3.bf16.msra.mxu0 %v5722_v53 }
 0x2a4   : > { %5727 = vmatprep.subr.bf16.mxu0 %v5726_v17 }
 0x2a5   : > { %5205 = vmatmul.mubr.f32.gmra.mrb[28].mxu1 %v2831_v59  ;;  %v2848_v59 = vld [vmem:[#allocation2 + $0x199] sm:$0xff] }
 0x2a6   : > { %5207 = vmatprep.mubr.f32.mxu1 %v2832_v6  ;;  %5709 = vmatpush3.bf16.msra.mxu1 %v5706_v56  ;;  %v5730_v56 = vpack.c.bf16 %v3510_v41, %v3509_v7  ;;  %v2847_v6 = vld [vmem:[#allocation2 + $0x189] sm:$0xff] }
 0x2a7   : > { %5711 = vmatprep.subr.bf16.mxu1 %v5710_v28  ;;  %5729 = vmatpush3.bf16.msra.mxu0 %v5726_v17 }
 0x2a8   : > { %5731 = vmatprep.subr.bf16.mxu0 %v5730_v56 }
 0x2a9   : > { %5208 = vmatmul.mubr.f32.gmra.mrb[30].mxu1 %v2833_v31  ;;  %v2849_v31 = vld [vmem:[#allocation2 + $0x1a1] sm:$0xff] }
 0x2aa   : > { %5210 = vmatprep.mubr.f32.mxu1 %v2834_v63  ;;  %5713 = vmatpush3.bf16.msra.mxu1 %v5710_v28  ;;  %v5734_v28 = vpack.c.bf16 %v3512_v29, %v3511_v5 }
 0x2ab   : > { %5733 = vmatpush3.bf16.msra.mxu0 %v5730_v56 }
 0x2ac   : > { %5735 = vmatprep.subr.bf16.mxu0 %v5734_v28 }
 0x2ad   : > { %5211 = vmatmul.mubr.f32.gmra.mrb[0].mxu1 %v2835_v51  ;;  %v3515_v51 = vld [vmem:[#allocation9 + $0x70] sm:$0xff] }
 0x2ae   : > { %5213 = vmatprep.mubr.f32.mxu1 %v2836_v16  ;;  %v3516_v16 = vld [vmem:[#allocation9 + $0x78] sm:$0xff] }
 0x2af   : > { %5737 = vmatpush3.bf16.msra.mxu0 %v5734_v28 }
 0x2b1   : > { %5214 = vmatmul.mubr.f32.gmra.mrb[2].mxu1 %v2837_v50  ;;  %v5742_v50 = vpack.c.bf16 %v3516_v16, %v3515_v51 }
 0x2b2   : > { %5216 = vmatprep.mubr.f32.mxu1 %v2838_v22 }
 0x2b5   : > { %5217 = vmatmul.mubr.f32.gmra.mrb[4].mxu1 %v2839_v14 }
 0x2b6   : > { %5219 = vmatprep.mubr.f32.mxu1 %v2840_v33 }
 0x2b9   : > { %5220 = vmatmul.mubr.f32.gmra.mrb[6].mxu1 %v2841_v49 }
 0x2ba   : > { %5222 = vmatprep.mubr.f32.mxu1 %v2842_v0 }
 0x2bd   : > { %5223 = vmatmul.mubr.f32.gmra.mrb[8].mxu1 %v2843_v52 }
 0x2be   : > { %5225 = vmatprep.mubr.f32.mxu1 %v2844_v13 }
 0x2c1   : > { %5226 = vmatmul.mubr.f32.gmra.mrb[10].mxu1 %v2845_v9 }
 0x2c2   : > { %5228 = vmatprep.mubr.f32.mxu1 %v2846_v4 }
 0x2c5   : > { %5229 = vmatmul.mubr.f32.gmra.mrb[12].mxu1 %v2847_v6 }
 0x2c6   : > { %5231 = vmatprep.mubr.f32.mxu1 %v2848_v59 }
 0x2c9   : > { %5232 = vmatmul.mubr.f32.gmra.mrb[14].mxu1 %v2849_v31 }
 0x2ca   : > { %5266 = vmatprep.mubr.f32.mxu1 %v7030_v10 }
 0x2cd   : > { %5267 = vmatmul.mubr.f32.vlgmr.msra.gmra.mrb[16].mxu1 %v7036_v19 }
 0x2ce   : > { %5269 = vmatprep.mubr.f32.mxu1 %v7042_v45 }
 0x2d1   : > { %5270 = vmatmul.mubr.f32.gmra.mrb[18].mxu1 %v7046_v24 }
 0x2d2   : > { %5272 = vmatprep.mubr.f32.mxu1 %v7051_v1 }
 0x2d5   : > { %5273 = vmatmul.mubr.f32.gmra.mrb[20].mxu1 %v7054_v12 }
 0x2d6   : > { %5275 = vmatprep.mubr.f32.mxu1 %v7060_v26 }
 0x2d9   : > { %5276 = vmatmul.mubr.f32.gmra.mrb[22].mxu1 %v7063_v42 }
 0x2da   : > { %5278 = vmatprep.mubr.f32.mxu1 %v7069_v55  ;;  %v3154_v55 = vld [vmem:[#allocation2 + $0x19a] sm:$0xff] }
 0x2dd   : > { %5279 = vmatmul.mubr.f32.gmra.mrb[24].mxu1 %v7072_v18 }
 0x2de   : > { %5281 = vmatprep.mubr.f32.mxu1 %v7077_v35 }
 0x2e1   : > { %5282 = vmatmul.mubr.f32.gmra.mrb[26].mxu1 %v7082_v44  ;;  %v3155_v44 = vld [vmem:[#allocation2 + $0x1a2] sm:$0xff] }
 0x2e2   : > { %5284 = vmatprep.mubr.f32.mxu1 %v7087_v40 }
 0x2e5   : > { %5285 = vmatmul.mubr.f32.gmra.mrb[28].mxu1 %v7092_v30 }
 0x2e6   : > { %5287 = vmatprep.mubr.f32.mxu1 %v7097_v47 }
 0x2e9   : > { %5288 = vmatmul.mubr.f32.gmra.mrb[30].mxu1 %v7102_v8 }
 0x2ea   : > { %5290 = vmatprep.mubr.f32.mxu1 %v7107_v43 }
 0x2ed   : > { %5291 = vmatmul.mubr.f32.gmra.mrb[0].mxu1 %v7111_v60 }
 0x2ee   : > { %5293 = vmatprep.mubr.f32.mxu1 %v7115_v2 }
 0x2f1   : > { %5294 = vmatmul.mubr.f32.gmra.mrb[2].mxu1 %v7119_v3 }
 0x2f2   : > { %5296 = vmatprep.mubr.f32.mxu1 %v7123_v11 }
 0x2f4   : > { %v7216_v10 = vpop.f32.mrb[48].mxu0 }
 0x2f5   : > { %5297 = vmatmul.mubr.f32.gmra.mrb[4].mxu1 %v7127_v20  ;;  %v7219_v19 = vpop.f32.mrb[49].mxu0 }
 0x2f6   : > { %5299 = vmatprep.mubr.f32.mxu1 %v7131_v36 }
 0x2f8   : > { %v7222_v45 = vpop.f32.mrb[50].mxu0 }
 0x2f9   : > { %5300 = vmatmul.mubr.f32.gmra.mrb[6].mxu1 %v7135_v21  ;;  %v7225_v24 = vpop.f32.mrb[51].mxu0 }
 0x2fa   : > { %5302 = vmatprep.mubr.f32.mxu1 %v7139_v38 }
 0x2fc   : > { %v7228_v1 = vpop.f32.mrb[52].mxu0 }
 0x2fd   : > { %5303 = vmatmul.mubr.f32.gmra.mrb[8].mxu1 %v7143_v48  ;;  %v7231_v12 = vpop.f32.mrb[53].mxu0 }
 0x2fe   : > { %5305 = vmatprep.mubr.f32.mxu1 %v7147_v57  ;;  %v3513_v57 = vld [vmem:[#allocation9 + $0x60] sm:$0xff] }
 0x300   : > { %v7234_v26 = vpop.f32.mrb[54].mxu0 }
 0x301   : > { %5306 = vmatmul.mubr.f32.gmra.mrb[10].mxu1 %v7151_v58  ;;  %v7237_v42 = vpop.f32.mrb[55].mxu0  ;;  %v3514_v58 = vld [vmem:[#allocation9 + $0x68] sm:$0xff] }
 0x302   : > { %5308 = vmatprep.mubr.f32.mxu1 %v7162_v27  ;;  %v5738_v27 = vpack.c.bf16 %v3514_v58, %v3513_v57 }
 0x304   : > { %v7240_v18 = vpop.f32.mrb[56].mxu0  ;;  %5739 = vmatprep.subr.bf16.mxu0 %v5738_v27 }
 0x305   : > { %5309 = vmatmul.mubr.f32.gmra.mrb[12].mxu1 %v7167_v25  ;;  %v7243_v35 = vpop.f32.mrb[57].mxu0  ;;  %5741 = vmatpush3.bf16.msra.mxu0 %v5738_v27 }
 0x306   : > { %5311 = vmatprep.mubr.f32.mxu1 %v3154_v55  ;;  %5743 = vmatprep.subr.bf16.mxu0 %v5742_v50 }
 0x308   : > { %v7245_v40 = vpop.f32.mrb[58].mxu0 }
 0x309   : > { %5312 = vmatmul.mubr.f32.gmra.mrb[14].mxu1 %v3155_v44  ;;  %v7247_v30 = vpop.f32.mrb[59].mxu0  ;;  %5745 = vmatpush3.bf16.msra.mxu0 %v5742_v50 }
 0x30c   : > { %v7249_v47 = vpop.f32.mrb[60].mxu0 }
 0x30d   : > { %v7251_v8 = vpop.f32.mrb[61].mxu0 }
 0x310   : > { %v7253_v43 = vpop.f32.mrb[62].mxu0 }
 0x311   : > { %v7255_v60 = vpop.f32.mrb[63].mxu0 }
 0x314   : > { %v4868_v2 = vpop.f32.mrb[32].mxu0 }
 0x315   : > { %v1708_v3 = vpop.f32.mrb[33].mxu0 }
 0x318   : > { %v4871_v11 = vpop.f32.mrb[34].mxu0 }
 0x319   : > { %v1718_v20 = vpop.f32.mrb[35].mxu0 }
 0x31c   : > { %v4874_v36 = vpop.f32.mrb[36].mxu0 }
 0x31d   : > { %v1728_v21 = vpop.f32.mrb[37].mxu0 }
 0x320   : > { %v4877_v38 = vpop.f32.mrb[38].mxu0 }
 0x321   : > { %v1738_v48 = vpop.f32.mrb[39].mxu0 }
 0x324   : > { %v4880_v25 = vpop.f32.mrb[40].mxu0 }
 0x325   : > { %v1748_v63 = vpop.f32.mrb[41].mxu0 }
 0x328   : > { %v4883_v22 = vpop.f32.mrb[42].mxu0 }
 0x329   : > { %v1758_v23 = vpop.f32.mrb[43].mxu0 }
 0x32c   : > { %v4886_v39 = vpop.f32.mrb[44].mxu0 }
 0x32d   : > { %v7257_v37 = vpop.f32.mrb[45].mxu0 }
 0x330   : > { %v7259_v62 = vpop.f32.mrb[46].mxu0 }
 0x331   : > { %v7261_v32 = vpop.f32.mrb[47].mxu0 }
 0x3a0   : > { %v5268_v34 = vpop.f32.mrb[16].mxu1 }
 0x3a1   : > { %v5762_v54 = vadd.f32 %v5268_v34, %v4868_v2  ;;  %v3239_v14 = vpop.f32.mrb[17].mxu1 }
 0x3a2   : > { %v5763_v33 = vadd.f32 %v3239_v14, %v1708_v3 }
 0x3a3   : > { %v3438_v53 = vadd.f32 %v5762_v54, %v7266_v46 }
 0x3a4   : > { %v3437_v61 = vadd.f32 %v5763_v33, %v7266_v46  ;;  %v5271_v15 = vpop.f32.mrb[18].mxu1 }
 0x3a5   : > { %v5764_v49 = vadd.f32 %v5271_v15, %v4871_v11  ;;  %v3249_v0 = vpop.f32.mrb[19].mxu1  ;;  %v3470_v41 = vmax.f32 %v3438_v53, 0.0 }
 0x3a6   : > { %v3469_v17 = vmax.f32 %v3437_v61, 0.0  ;;  %v5765_v7 = vadd.f32 %v3249_v0, %v1718_v20 }
 0x3a7   : > { %v3440_v52 = vadd.f32 %v5764_v49, %v7266_v46 }
 0x3a8   : > { %v3439_v13 = vadd.f32 %v5765_v7, %v7266_v46  ;;  %v5274_v56 = vpop.f32.mrb[20].mxu1  ;;  %5346 = vmatprep.mubr.f32.mxu0 %v3469_v17 }
 0x3a9   : > { %v5766_v5 = vadd.f32 %v5274_v56, %v4874_v36  ;;  %v3259_v29 = vpop.f32.mrb[21].mxu1  ;;  %5347 = vmatmul.mubr.f32.vlgmr.msra.gmra.mrb[64].mxu0 %v3470_v41  ;;  %v3472_v28 = vmax.f32 %v3440_v52, 0.0 }
 0x3aa   : > { %v3471_v9 = vmax.f32 %v3439_v13, 0.0  ;;  %v5767_v4 = vadd.f32 %v3259_v29, %v1728_v21 }
 0x3ab   : > { %v3442_v59 = vadd.f32 %v5766_v5, %v7266_v46 }
 0x3ac   : > { %v3441_v6 = vadd.f32 %v5767_v4, %v7266_v46  ;;  %v5277_v31 = vpop.f32.mrb[22].mxu1  ;;  %5349 = vmatprep.mubr.f32.mxu0 %v3471_v9 }
 0x3ad   : > { %v5768_v55 = vadd.f32 %v5277_v31, %v4877_v38  ;;  %v3269_v44 = vpop.f32.mrb[23].mxu1  ;;  %5350 = vmatmul.mubr.f32.gmra.mrb[66].mxu0 %v3472_v28  ;;  %v3474_v11 = vmax.f32 %v3442_v59, 0.0 }
 0x3ae   : > { %v3473_v2 = vmax.f32 %v3441_v6, 0.0  ;;  %v5769_v3 = vadd.f32 %v3269_v44, %v1738_v48 }
 0x3af   : > { %v3444_v20 = vadd.f32 %v5768_v55, %v7266_v46 }
 0x3b0   : > { %v3443_v36 = vadd.f32 %v5769_v3, %v7266_v46  ;;  %v5280_v57 = vpop.f32.mrb[24].mxu1  ;;  %5352 = vmatprep.mubr.f32.mxu0 %v3473_v2 }
 0x3b1   : > { %v5770_v21 = vadd.f32 %v5280_v57, %v4880_v25  ;;  %v3279_v58 = vpop.f32.mrb[25].mxu1  ;;  %5353 = vmatmul.mubr.f32.gmra.mrb[68].mxu0 %v3474_v11  ;;  %v3476_v16 = vmax.f32 %v3444_v20, 0.0 }
 0x3b2   : > { %v3475_v27 = vmax.f32 %v3443_v36, 0.0  ;;  %v5771_v51 = vadd.f32 %v3279_v58, %v1748_v63 }
 0x3b3   : > { %v3446_v50 = vadd.f32 %v5770_v21, %v7266_v46 }
 0x3b4   : > { %v3445_v38 = vadd.f32 %v5771_v51, %v7266_v46  ;;  %v5283_v34 = vpop.f32.mrb[26].mxu1  ;;  %5355 = vmatprep.mubr.f32.mxu0 %v3475_v27 }
 0x3b5   : > { %v5772_v48 = vadd.f32 %v5283_v34, %v4883_v22  ;;  %v3289_v54 = vpop.f32.mrb[27].mxu1  ;;  %5356 = vmatmul.mubr.f32.gmra.mrb[70].mxu0 %v3476_v16  ;;  %v3478_v53 = vmax.f32 %v3446_v50, 0.0 }
 0x3b6   : > { %v3477_v14 = vmax.f32 %v3445_v38, 0.0  ;;  %v5773_v33 = vadd.f32 %v3289_v54, %v1758_v23 }
 0x3b7   : > { %v3448_v61 = vadd.f32 %v5772_v48, %v7266_v46 }
 0x3b8   : > { %v3447_v25 = vadd.f32 %v5773_v33, %v7266_v46  ;;  %v5286_v15 = vpop.f32.mrb[28].mxu1  ;;  %5358 = vmatprep.mubr.f32.mxu0 %v3477_v14 }
 0x3b9   : > { %v5774_v63 = vadd.f32 %v5286_v15, %v4886_v39  ;;  %v3299_v49 = vpop.f32.mrb[29].mxu1  ;;  %5359 = vmatmul.mubr.f32.gmra.mrb[72].mxu0 %v3478_v53  ;;  %v3480_v7 = vmax.f32 %v3448_v61, 0.0 }
 0x3ba   : > { %v3479_v0 = vmax.f32 %v3447_v25, 0.0  ;;  %v5775_v17 = vadd.f32 %v3299_v49, %v7257_v37 }
 0x3bb   : > { %v3450_v22 = vadd.f32 %v5774_v63, %v7266_v46 }
 0x3bc   : > { %v3449_v41 = vadd.f32 %v5775_v17, %v7266_v46  ;;  %v5289_v52 = vpop.f32.mrb[30].mxu1  ;;  %5361 = vmatprep.mubr.f32.mxu0 %v3479_v0 }
 0x3bd   : > { %v5776_v23 = vadd.f32 %v5289_v52, %v7259_v62  ;;  %v3309_v13 = vpop.f32.mrb[31].mxu1  ;;  %5362 = vmatmul.mubr.f32.gmra.mrb[74].mxu0 %v3480_v7  ;;  %v3482_v39 = vmax.f32 %v3450_v22, 0.0 }
 0x3be   : > { %v3481_v56 = vmax.f32 %v3449_v41, 0.0  ;;  %v5777_v5 = vadd.f32 %v3309_v13, %v7261_v32 }
 0x3bf   : > { %v3452_v29 = vadd.f32 %v5776_v23, %v7266_v46 }
 0x3c0   : > { %v3451_v9 = vadd.f32 %v5777_v5, %v7266_v46  ;;  %v5292_v37 = vpop.f32.mrb[0].mxu1  ;;  %5364 = vmatprep.mubr.f32.mxu0 %v3481_v56 }
 0x3c1   : > { %v5778_v4 = vadd.f32 %v5292_v37, %v7216_v10  ;;  %v3319_v28 = vpop.f32.mrb[1].mxu1  ;;  %5365 = vmatmul.mubr.f32.gmra.mrb[76].mxu0 %v3482_v39  ;;  %v3484_v62 = vmax.f32 %v3452_v29, 0.0 }
 0x3c2   : > { %v3483_v59 = vmax.f32 %v3451_v9, 0.0  ;;  %v5779_v6 = vadd.f32 %v3319_v28, %v7219_v19 }
 0x3c3   : > { %v3454_v31 = vadd.f32 %v5778_v4, %v7266_v46 }
 0x3c4   : > { %v3453_v55 = vadd.f32 %v5779_v6, %v7266_v46  ;;  %v5295_v32 = vpop.f32.mrb[2].mxu1  ;;  %5367 = vmatprep.mubr.f32.mxu0 %v3483_v59 }
 0x3c5   : > { %v5780_v44 = vadd.f32 %v5295_v32, %v7222_v45  ;;  %v3329_v2 = vpop.f32.mrb[3].mxu1  ;;  %5368 = vmatmul.mubr.f32.gmra.mrb[78].mxu0 %v3484_v62  ;;  %v3486_v10 = vmax.f32 %v3454_v31, 0.0 }
 0x3c6   : > { %v3485_v3 = vmax.f32 %v3453_v55, 0.0  ;;  %v5781_v11 = vadd.f32 %v3329_v2, %v7225_v24 }
 0x3c7   : > { %v3456_v20 = vadd.f32 %v5780_v44, %v7266_v46  ;;  %v6102_v44 = vld [vmem:[%s6584_s8] sm:$0xff] }
 0x3c8   : > { %v3455_v36 = vadd.f32 %v5781_v11, %v7266_v46  ;;  %v5298_v19 = vpop.f32.mrb[4].mxu1  ;;  %5370 = vmatprep.mubr.f32.mxu0 %v3485_v3 }
 0x3c9   : > { %v5782_v57 = vadd.f32 %v5298_v19, %v7228_v1  ;;  %v3339_v21 = vpop.f32.mrb[5].mxu1  ;;  %5371 = vmatmul.mubr.f32.gmra.mrb[80].mxu0 %v3486_v10  ;;  %v3488_v45 = vmax.f32 %v3456_v20, 0.0 }
 0x3ca   : > { %v3487_v58 = vmax.f32 %v3455_v36, 0.0  ;;  %v5783_v27 = vadd.f32 %v3339_v21, %v7231_v12 }
 0x3cb   : > { %v3458_v51 = vadd.f32 %v5782_v57, %v7266_v46  ;;  %v6103_v57 = vld [vmem:[%s6584_s8 + $0x18] sm:$0xff] }
 0x3cc   : > { %v3457_v16 = vadd.f32 %v5783_v27, %v7266_v46  ;;  %v5301_v24 = vpop.f32.mrb[6].mxu1  ;;  %5373 = vmatprep.mubr.f32.mxu0 %v3487_v58  ;;  %v6104_v58 = vld [vmem:[%s6584_s8 + $0x10] sm:$0xff] }
 0x3cd   : > { %v5784_v50 = vadd.f32 %v5301_v24, %v7234_v26  ;;  %v3349_v38 = vpop.f32.mrb[7].mxu1  ;;  %5374 = vmatmul.mubr.f32.gmra.mrb[82].mxu0 %v3488_v45  ;;  %v3490_v1 = vmax.f32 %v3458_v51, 0.0 }
 0x3ce   : > { %v3489_v34 = vmax.f32 %v3457_v16, 0.0  ;;  %v5785_v48 = vadd.f32 %v3349_v38, %v7237_v42 }
 0x3cf   : > { %v3460_v54 = vadd.f32 %v5784_v50, %v7266_v46 }
 0x3d0   : > { %v3459_v14 = vadd.f32 %v5785_v48, %v7266_v46  ;;  %v5304_v12 = vpop.f32.mrb[8].mxu1  ;;  %5376 = vmatprep.mubr.f32.mxu0 %v3489_v34  ;;  %v6105_v34 = vld [vmem:[%s6584_s8 + $0x28] sm:$0xff] }
 0x3d1   : > { %v5786_v33 = vadd.f32 %v5304_v12, %v7240_v18  ;;  %v3359_v53 = vpop.f32.mrb[9].mxu1  ;;  %5377 = vmatmul.mubr.f32.gmra.mrb[84].mxu0 %v3490_v1  ;;  %v3492_v26 = vmax.f32 %v3460_v54, 0.0  ;;  %v6106_v1 = vld [vmem:[%s6584_s8 + $0x20] sm:$0xff] }
 0x3d2   : > { %v3491_v61 = vmax.f32 %v3459_v14, 0.0  ;;  %v5787_v25 = vadd.f32 %v3359_v53, %v7243_v35 }
 0x3d3   : > { %v3462_v15 = vadd.f32 %v5786_v33, %v7266_v46 }
 0x3d4   : > { %v3461_v63 = vadd.f32 %v5787_v25, %v7266_v46  ;;  %v5307_v42 = vpop.f32.mrb[10].mxu1  ;;  %5379 = vmatprep.mubr.f32.mxu0 %v3491_v61 }
 0x3d5   : > { %v5788_v49 = vadd.f32 %v5307_v42, %v7245_v40  ;;  %v3369_v0 = vpop.f32.mrb[11].mxu1  ;;  %5380 = vmatmul.mubr.f32.gmra.mrb[86].mxu0 %v3492_v26  ;;  %v3494_v18 = vmax.f32 %v3462_v15, 0.0  ;;  %v6107_v26 = vld [vmem:[%s6584_s8 + $0x38] sm:$0xff] }
 0x3d6   : > { %v3493_v17 = vmax.f32 %v3461_v63, 0.0  ;;  %v5789_v7 = vadd.f32 %v3369_v0, %v7247_v30  ;;  %v6108_v63 = vld [vmem:[%s6584_s8 + $0x30] sm:$0xff] }
 0x3d7   : > { %v3464_v22 = vadd.f32 %v5788_v49, %v7266_v46 }
 0x3d8   : > { %v3463_v41 = vadd.f32 %v5789_v7, %v7266_v46  ;;  %v5310_v35 = vpop.f32.mrb[12].mxu1  ;;  %5382 = vmatprep.mubr.f32.mxu0 %v3493_v17 }
 0x3d9   : > { %v5790_v52 = vadd.f32 %v5310_v35, %v7249_v47  ;;  %v3379_v23 = vpop.f32.mrb[13].mxu1  ;;  %5383 = vmatmul.mubr.f32.gmra.mrb[88].mxu0 %v3494_v18  ;;  %v3496_v40 = vmax.f32 %v3464_v22, 0.0 }
 0x3da   : > { %v3495_v13 = vmax.f32 %v3463_v41, 0.0  ;;  %v5791_v56 = vadd.f32 %v3379_v23, %v7251_v8  ;;  %v6109_v41 = vld [vmem:[%s6584_s8 + $0x48] sm:$0xff] }
 0x3db   : > { %v3466_v5 = vadd.f32 %v5790_v52, %v7266_v46  ;;  %v6110_v52 = vld [vmem:[%s6584_s8 + $0x40] sm:$0xff] }
 0x3dc   : > { %v3465_v39 = vadd.f32 %v5791_v56, %v7266_v46  ;;  %v5313_v30 = vpop.f32.mrb[14].mxu1  ;;  %5385 = vmatprep.mubr.f32.mxu0 %v3495_v13 }
 0x3dd   : > { %v5792_v29 = vadd.f32 %v5313_v30, %v7253_v43  ;;  %v3389_v9 = vpop.f32.mrb[15].mxu1  ;;  %5386 = vmatmul.mubr.f32.gmra.mrb[90].mxu0 %v3496_v40  ;;  %v3498_v4 = vmax.f32 %v3466_v5, 0.0  ;;  %v7322_v43 = vld [vmem:[%s7481_s6] ss:$0 sm:$0xff] }
 0x3de   : > { %v3497_v37 = vmax.f32 %v3465_v39, 0.0  ;;  %v5793_v47 = vadd.f32 %v3389_v9, %v7255_v60 }
 0x3df   : > { %v3468_v28 = vadd.f32 %v5792_v29, %v7266_v46  ;;  %v6111_v29 = vld [vmem:[%s6584_s8 + $0x58] sm:$0xff] }
 0x3e0   : > { %v3467_v8 = vadd.f32 %v5793_v47, %v7266_v46  ;;  %5388 = vmatprep.mubr.f32.mxu0 %v3497_v37  ;;  %v6101_v46 = vld [vmem:[%s6584_s8 + $0x8] sm:$0xff]  ;;  %v6112_v37 = vld [vmem:[%s6584_s8 + $0x50] sm:$0xff] }
 0x3e1   : > { %5389 = vmatmul.mubr.f32.gmra.mrb[92].mxu0 %v3498_v4  ;;  %v3500_v6 = vmax.f32 %v3468_v28, 0.0 }
 0x3e2   : > { %v3499_v59 = vmax.f32 %v3467_v8, 0.0 }
 0x3e4   : > { %5391 = vmatprep.mubr.f32.mxu0 %v3499_v59 }
 0x3e5   : > { %5392 = vmatmul.mubr.f32.gmra.mrb[94].mxu0 %v3500_v6 }
 0x47c   : > { %v5348_v62 = vpop.f32.mrb[64].mxu0 }
 0x47d   : > { %v3596_v60 = vadd.f32 %v5348_v62, %v7322_v43  ;;  %v3590_v31 = vpop.f32.mrb[65].mxu0 }
 0x47e   : > { %v3591_v55 = vadd.f32 %v7322_v43, %v3590_v31 }
 0x47f   : > { %v3750_v32 = vadd.f32 %v6101_v46, %v3596_v60  ;;  %v6113_v60 = vld [vmem:[%s6584_s8 + $0x68] sm:$0xff] }
 0x480   : > { %v3749_v2 = vadd.f32 %v6102_v44, %v3591_v55  ;;  %v5351_v3 = vpop.f32.mrb[66].mxu0  ;;  %v6114_v55 = vld [vmem:[%s6584_s8 + $0x60] sm:$0xff] }
 0x481   : > { %v3782_v11 = vmax.f32 %v3750_v32, 0.0  ;;  %v3606_v10 = vadd.f32 %v5351_v3, %v7322_v43  ;;  %v3600_v20 = vpop.f32.mrb[67].mxu0 }
 0x482   : > { %v3781_v36 = vmax.f32 %v3749_v2, 0.0  ;;  %v3601_v19 = vadd.f32 %v7322_v43, %v3600_v20  ;;  %v6115_v20 = vld [vmem:[%s6584_s8 + $0x78] sm:$0xff] }
 0x483   : > { %3814 = vst [vmem:[%s7332_s12 + $0x8] sm:$0xff] %v3782_v11  ;;  %v3752_v21 = vadd.f32 %v6103_v57, %v3606_v10 }
 0x484   : > { %3813 = vst [vmem:[%s7332_s12] sm:$0xff] %v3781_v36  ;;  %v3751_v27 = vadd.f32 %v6104_v58, %v3601_v19  ;;  %v5354_v45 = vpop.f32.mrb[68].mxu0  ;;  %v6116_v19 = vld [vmem:[%s6584_s8 + $0x70] sm:$0xff] }
 0x485   : > { %v3784_v51 = vmax.f32 %v3752_v21, 0.0  ;;  %v3616_v16 = vadd.f32 %v5354_v45, %v7322_v43  ;;  %v3610_v24 = vpop.f32.mrb[69].mxu0 }
 0x486   : > { %v3783_v50 = vmax.f32 %v3751_v27, 0.0  ;;  %v3611_v38 = vadd.f32 %v7322_v43, %v3610_v24  ;;  %v6117_v24 = vld [vmem:[%s6584_s8 + $0x88] sm:$0xff] }
 0x487   : > { %3816 = vst [vmem:[%s7332_s12 + $0x18] sm:$0xff] %v3784_v51  ;;  %v3754_v48 = vadd.f32 %v6105_v34, %v3616_v16 }
 0x488   : > { %3815 = vst [vmem:[%s7332_s12 + $0x10] sm:$0xff] %v3783_v50  ;;  %v3753_v54 = vadd.f32 %v6106_v1, %v3611_v38  ;;  %v5357_v14 = vpop.f32.mrb[70].mxu0  ;;  %v6118_v38 = vld [vmem:[%s6584_s8 + $0x80] sm:$0xff] }
 0x489   : > { %v3786_v12 = vmax.f32 %v3754_v48, 0.0  ;;  %v3626_v33 = vadd.f32 %v5357_v14, %v7322_v43  ;;  %v3620_v53 = vpop.f32.mrb[71].mxu0 }
 0x48a   : > { %v3785_v61 = vmax.f32 %v3753_v54, 0.0  ;;  %v3621_v25 = vadd.f32 %v7322_v43, %v3620_v53  ;;  %v6119_v53 = vld [vmem:[%s6584_s8 + $0x98] sm:$0xff] }
 0x48b   : > { %3818 = vst [vmem:[%s7332_s12 + $0x28] sm:$0xff] %v3786_v12  ;;  %v3756_v15 = vadd.f32 %v6107_v26, %v3626_v33 }
 0x48c   : > { %3817 = vst [vmem:[%s7332_s12 + $0x20] sm:$0xff] %v3785_v61  ;;  %v3755_v42 = vadd.f32 %v6108_v63, %v3621_v25  ;;  %v5360_v49 = vpop.f32.mrb[72].mxu0  ;;  %v6120_v25 = vld [vmem:[%s6584_s8 + $0x90] sm:$0xff] }
 0x48d   : > { %v3788_v0 = vmax.f32 %v3756_v15, 0.0  ;;  %v3636_v17 = vadd.f32 %v5360_v49, %v7322_v43  ;;  %v3630_v7 = vpop.f32.mrb[73].mxu0 }
 0x48e   : > { %v3787_v18 = vmax.f32 %v3755_v42, 0.0  ;;  %v3631_v22 = vadd.f32 %v7322_v43, %v3630_v7  ;;  %v6121_v7 = vld [vmem:[%s6584_s8 + $0xa8] sm:$0xff] }
 0x48f   : > { %3820 = vst [vmem:[%s7332_s12 + $0x38] sm:$0xff] %v3788_v0  ;;  %v3758_v35 = vadd.f32 %v6109_v41, %v3636_v17 }
 0x490   : > { %3819 = vst [vmem:[%s7332_s12 + $0x30] sm:$0xff] %v3787_v18  ;;  %v3757_v23 = vadd.f32 %v6110_v52, %v3631_v22  ;;  %v5363_v13 = vpop.f32.mrb[74].mxu0  ;;  %v6122_v22 = vld [vmem:[%s6584_s8 + $0xa0] sm:$0xff] }
 0x491   : > { %v3790_v56 = vmax.f32 %v3758_v35, 0.0  ;;  %v3646_v40 = vadd.f32 %v5363_v13, %v7322_v43  ;;  %v3640_v5 = vpop.f32.mrb[75].mxu0 }
 0x492   : > { %v3789_v39 = vmax.f32 %v3757_v23, 0.0  ;;  %v3641_v30 = vadd.f32 %v7322_v43, %v3640_v5  ;;  %v6123_v5 = vld [vmem:[%s6584_s8 + $0xb8] sm:$0xff] }
 0x493   : > { %3822 = vst [vmem:[%s7332_s12 + $0x48] sm:$0xff] %v3790_v56  ;;  %v3760_v9 = vadd.f32 %v6111_v29, %v3646_v40 }
 0x494   : > { %3821 = vst [vmem:[%s7332_s12 + $0x40] sm:$0xff] %v3789_v39  ;;  %v3759_v47 = vadd.f32 %v6112_v37, %v3641_v30  ;;  %v5366_v4 = vpop.f32.mrb[76].mxu0  ;;  %v6124_v30 = vld [vmem:[%s6584_s8 + $0xb0] sm:$0xff] }
 0x495   : > { %v3792_v28 = vmax.f32 %v3760_v9, 0.0  ;;  %v3656_v8 = vadd.f32 %v5366_v4, %v7322_v43  ;;  %v3650_v59 = vpop.f32.mrb[77].mxu0 }
 0x496   : > { %v3791_v6 = vmax.f32 %v3759_v47, 0.0  ;;  %v3651_v62 = vadd.f32 %v7322_v43, %v3650_v59  ;;  %v6125_v59 = vld [vmem:[%s6584_s8 + $0xc8] sm:$0xff] }
 0x497   : > { %3824 = vst [vmem:[%s7332_s12 + $0x58] sm:$0xff] %v3792_v28  ;;  %v3762_v31 = vadd.f32 %v6113_v60, %v3656_v8 }
 0x498   : > { %3823 = vst [vmem:[%s7332_s12 + $0x50] sm:$0xff] %v3791_v6  ;;  %v3761_v46 = vadd.f32 %v6114_v55, %v3651_v62  ;;  %v5369_v32 = vpop.f32.mrb[78].mxu0  ;;  %v6126_v62 = vld [vmem:[%s6584_s8 + $0xc0] sm:$0xff] }
 0x499   : > { %v3794_v44 = vmax.f32 %v3762_v31, 0.0  ;;  %v3666_v2 = vadd.f32 %v5369_v32, %v7322_v43  ;;  %v3660_v3 = vpop.f32.mrb[79].mxu0 }
 0x49a   : > { %v3793_v11 = vmax.f32 %v3761_v46, 0.0  ;;  %v3661_v10 = vadd.f32 %v7322_v43, %v3660_v3  ;;  %v6127_v3 = vld [vmem:[%s6584_s8 + $0xd8] sm:$0xff] }
 0x49b   : > { %3826 = vst [vmem:[%s7332_s12 + $0x68] sm:$0xff] %v3794_v44  ;;  %v3764_v36 = vadd.f32 %v6115_v20, %v3666_v2 }
 0x49c   : > { %3825 = vst [vmem:[%s7332_s12 + $0x60] sm:$0xff] %v3793_v11  ;;  %v3763_v57 = vadd.f32 %v6116_v19, %v3661_v10  ;;  %v5372_v21 = vpop.f32.mrb[80].mxu0  ;;  %v6128_v10 = vld [vmem:[%s6584_s8 + $0xd0] sm:$0xff] }
 0x49d   : > { %v3796_v58 = vmax.f32 %v3764_v36, 0.0  ;;  %v3676_v27 = vadd.f32 %v5372_v21, %v7322_v43  ;;  %v3670_v45 = vpop.f32.mrb[81].mxu0 }
 0x49e   : > { %v3795_v51 = vmax.f32 %v3763_v57, 0.0  ;;  %v3671_v16 = vadd.f32 %v7322_v43, %v3670_v45  ;;  %v6129_v45 = vld [vmem:[%s6584_s8 + $0xe8] sm:$0xff] }
 0x49f   : > { %3828 = vst [vmem:[%s7332_s12 + $0x78] sm:$0xff] %v3796_v58  ;;  %v3766_v50 = vadd.f32 %v6117_v24, %v3676_v27 }
 0x4a0   : > { %3827 = vst [vmem:[%s7332_s12 + $0x70] sm:$0xff] %v3795_v51  ;;  %v3765_v34 = vadd.f32 %v6118_v38, %v3671_v16  ;;  %v5375_v48 = vpop.f32.mrb[82].mxu0  ;;  %v6130_v16 = vld [vmem:[%s6584_s8 + $0xe0] sm:$0xff] }
 0x4a1   : > { %v3798_v1 = vmax.f32 %v3766_v50, 0.0  ;;  %v3686_v54 = vadd.f32 %v5375_v48, %v7322_v43  ;;  %v3680_v14 = vpop.f32.mrb[83].mxu0 }
 0x4a2   : > { %v3797_v12 = vmax.f32 %v3765_v34, 0.0  ;;  %v3681_v33 = vadd.f32 %v7322_v43, %v3680_v14  ;;  %v6131_v14 = vld [vmem:[%s6584_s8 + $0xf8] sm:$0xff] }
 0x4a3   : > { %3830 = vst [vmem:[%s7332_s12 + $0x88] sm:$0xff] %v3798_v1  ;;  %v3768_v61 = vadd.f32 %v6119_v53, %v3686_v54 }
 0x4a4   : > { %3829 = vst [vmem:[%s7332_s12 + $0x80] sm:$0xff] %v3797_v12  ;;  %v3767_v26 = vadd.f32 %v6120_v25, %v3681_v33  ;;  %v5378_v15 = vpop.f32.mrb[84].mxu0  ;;  %v6132_v33 = vld [vmem:[%s6584_s8 + $0xf0] sm:$0xff]  ;;  %s6330_s8 = smov [#allocation11]  }
 0x4a5   : > { %v3800_v63 = vmax.f32 %v3768_v61, 0.0  ;;  %v3696_v42 = vadd.f32 %v5378_v15, %v7322_v43  ;;  %v3690_v49 = vpop.f32.mrb[85].mxu0  ;;  %s6251_s30 = sshll.u32 %s6330_s8, 4  ;;  %s6252_s30 = int_to_ptr.vmem [resolvable:$false] %s6251_s30 }
 0x4a6   : > { %v3799_v0 = vmax.f32 %v3767_v26, 0.0  ;;  %v3691_v17 = vadd.f32 %v7322_v43, %v3690_v49  ;;  %s6253_s9 = scalar_lea.vmem %s6252_s30, 8192  ;;  %p6254_p12 = scmp.lt.s32.totalorder %s7429_s21, %s6252_s30 }
 0x4a7   : > { %3832 = vst [vmem:[%s7332_s12 + $0x98] sm:$0xff] %v3800_v63  ;;  %v3770_v18 = vadd.f32 %v6121_v7, %v3696_v42  ;;  %p6255_p1 = scmp.lt.s32.totalorder %s6253_s9, %s6247_s11 }
 0x4a8   : > { %3831 = vst [vmem:[%s7332_s12 + $0x90] sm:$0xff] %v3799_v0  ;;  %v3769_v41 = vadd.f32 %v6122_v22, %v3691_v17  ;;  %v5381_v35 = vpop.f32.mrb[86].mxu0 }
 0x4a9   : > { %v3802_v52 = vmax.f32 %v3770_v18, 0.0  ;;  %v3706_v23 = vadd.f32 %v5381_v35, %v7322_v43  ;;  %v3700_v13 = vpop.f32.mrb[87].mxu0  ;;  %p6256_p2 = por %p6255_p1, %p6254_p12 }
 0x4aa   : > { %v3801_v56 = vmax.f32 %v3769_v41, 0.0  ;;  %v3701_v40 = vadd.f32 %v7322_v43, %v3700_v13 }
 0x4ab   : > { %3834 = vst [vmem:[%s7332_s12 + $0xa8] sm:$0xff] %v3802_v52  ;;  %v3772_v39 = vadd.f32 %v6123_v5, %v3706_v23  ;;  %p6257_p4 = pnand %p6256_p2, %p6250_p7 }
 0x4ac   : > { %3833 = vst [vmem:[%s7332_s12 + $0xa0] sm:$0xff] %v3801_v56  ;;  %v3771_v29 = vadd.f32 %v6124_v30, %v3701_v40  ;;  %v5384_v9 = vpop.f32.mrb[88].mxu0 }
 0x4ad   : > { %v3804_v37 = vmax.f32 %v3772_v39, 0.0  ;;  %v3716_v47 = vadd.f32 %v5384_v9, %v7322_v43  ;;  %v3710_v4 = vpop.f32.mrb[89].mxu0 }
 0x4ae   : > { %v3803_v28 = vmax.f32 %v3771_v29, 0.0  ;;  %v3711_v8 = vadd.f32 %v7322_v43, %v3710_v4 }
 0x4af   : > { %3836 = vst [vmem:[%s7332_s12 + $0xb8] sm:$0xff] %v3804_v37  ;;  %v3774_v6 = vadd.f32 %v6125_v59, %v3716_v47 }
 0x4b0   : > { %3835 = vst [vmem:[%s7332_s12 + $0xb0] sm:$0xff] %v3803_v28  ;;  %v3773_v60 = vadd.f32 %v6126_v62, %v3711_v8  ;;  %v5387_v31 = vpop.f32.mrb[90].mxu0 }
 0x4b1   : > { %v3806_v55 = vmax.f32 %v3774_v6, 0.0  ;;  %v3726_v46 = vadd.f32 %v5387_v31, %v7322_v43  ;;  %v3720_v32 = vpop.f32.mrb[91].mxu0 }
 0x4b2   : > { %v3805_v44 = vmax.f32 %v3773_v60, 0.0  ;;  %v3721_v2 = vadd.f32 %v7322_v43, %v3720_v32 }
 0x4b3   : > { %3838 = vst [vmem:[%s7332_s12 + $0xc8] sm:$0xff] %v3806_v55  ;;  %v3776_v11 = vadd.f32 %v6127_v3, %v3726_v46 }
 0x4b4   : > { %3837 = vst [vmem:[%s7332_s12 + $0xc0] sm:$0xff] %v3805_v44  ;;  %v3775_v20 = vadd.f32 %v6128_v10, %v3721_v2  ;;  %v5390_v36 = vpop.f32.mrb[92].mxu0 }
 0x4b5   : > { %v3808_v19 = vmax.f32 %v3776_v11, 0.0  ;;  %v3736_v57 = vadd.f32 %v5390_v36, %v7322_v43  ;;  %v3730_v21 = vpop.f32.mrb[93].mxu0 }
 0x4b6   : > { %v3807_v58 = vmax.f32 %v3775_v20, 0.0  ;;  %v3731_v27 = vadd.f32 %v7322_v43, %v3730_v21 }
 0x4b7   : > { %3840 = vst [vmem:[%s7332_s12 + $0xd8] sm:$0xff] %v3808_v19  ;;  %v3778_v51 = vadd.f32 %v6129_v45, %v3736_v57 }
 0x4b8   : > { %3839 = vst [vmem:[%s7332_s12 + $0xd0] sm:$0xff] %v3807_v58  ;;  %v3777_v24 = vadd.f32 %v6130_v16, %v3731_v27  ;;  %v5393_v50 = vpop.f32.mrb[94].mxu0 }
 0x4b9   : > { %v3810_v38 = vmax.f32 %v3778_v51, 0.0  ;;  %v3746_v34 = vadd.f32 %v5393_v50, %v7322_v43  ;;  %v3740_v48 = vpop.f32.mrb[95].mxu0 }
 0x4ba   : > { %v3809_v1 = vmax.f32 %v3777_v24, 0.0  ;;  %v3741_v54 = vadd.f32 %v7322_v43, %v3740_v48 }
 0x4bb   : > { %3842 = vst [vmem:[%s7332_s12 + $0xe8] sm:$0xff] %v3810_v38  ;;  %v3780_v12 = vadd.f32 %v6131_v14, %v3746_v34 }
 0x4bc   : > { %3841 = vst [vmem:[%s7332_s12 + $0xe0] sm:$0xff] %v3809_v1  ;;  %v3779_v53 = vadd.f32 %v6132_v33, %v3741_v54 }
 0x4bd   : > { %v3812_v61 = vmax.f32 %v3780_v12, 0.0 }
 0x4be   : > { %v3811_v43 = vmax.f32 %v3779_v53, 0.0 }
 0x4bf   : > { %3844 = vst [vmem:[%s7332_s12 + $0xf8] sm:$0xff] %v3812_v61 }
 0x4c0   : > { %3843 = vst [vmem:[%s7332_s12 + $0xf0] sm:$0xff] %v3811_v43 }
 0x4c1   : > { %6260 = shalt.err (!%p6257_p4)
}
 0x4c2   : > { %s6261_s13 = scalar_lea.hbm %s7427_s23, 4096  ;;  %s6265_s14 = scalar_lea.hbm %s7482_s7, 8192 }
 0x4c3   : > { %p6262_p9 = scmp.ne.s32.totalorder %s7427_s23, %s6261_s13  ;;  %p6266_p8 = scmp.lt.u32.totalorder %s7427_s23, %s7482_s7 }
 0x4c4   : > { %p6267_p13 = scmp.lt.u32.totalorder %s6265_s14, %s6261_s13  ;;  %p6269_p10 = scmp.lt.u32.totalorder %s6261_s13, %s7427_s23 }
 0x4c5   : > { %p6263_p0 = pnand %p6262_p9, %p6527_p5 }
 0x4c6   : > { %p6268_p6 = por %p6267_p13, %p6266_p8 }
 0x4c7   : > { %p6264_p11 = pneg %p6263_p0 }
 0x4c8   : > { %p6270_p3 = por %p6269_p10, %p6268_p6 }
 0x4ca   : > { %p6271_p7 = pnand %p6270_p3, %p6264_p11 }
 0x4cc   : > { %6274 = shalt.err (!%p6271_p7)
}
 0x4cd   : > { %s6331_s16 = smov 128   ;;  %s6332_s29 = smov 8  }
 0x4ce   : > { %6032 = dma.vmem_to_hbm [thread:$0]  (%p6527_p5), %s7429_s21, 4096, %s7427_s23, %s3846_s28, %s6331_s16, %s6331_s16, %s6332_s29  }
 0x4cf PF: > { %s7544_s11 = sld [smem:[#allocation16_spill]]  ;;  %s3874_s8 = sand.u32 1, %s6309_s24  }
 0x4d0   : > { %p7546_p1 = scmp.ge.s32.totalorder %s6321_s27, 2  ;;  %s3875_s30 = scalar_lea.sflag [#allocation5], %s3874_s8 }
 0x4d5   : > { %p7545_p12 = scmp.ne.s32.totalorder %s7544_s11, 0 }
 0x4d7   : > { %p6049_p2 = pnand %p7546_p1, %p7545_p12 }
 0x4d9   : > { %6304 = dma.done.wait (!%p6049_p2), %s3875_s30, 4096  }
 0x4da   : > { %6306 = vsyncadd (!%p6049_p2), %s3875_s30, 4294963200  ;;  %p22_p4 = scmp.ge.s32.totalorder %s6513_s22, 4   ;;  %s7547_s24 = smov %s6313_s25 }
 0x4db   : > { %s7548_s25 = smov %s6317_s26  ;;  %s7549_s26 = smov %s6523_s18 }
 0x4dc   : > { %s7550_s27 = smov %s6513_s22  ;;  %24 = sbr.rel (!%p22_p4) target bundleno = 7 (0x7), region = 115 }
 0x4e3   :  { %3880 = vsyncpa [#allocation4], 1 }
 0x4e4   :  { %3882 = vsyncpa [#allocation4 + $0x1], 1 }
 0x4e5   :  { %3883 = vsyncpa [#allocation7], 1 }
 0x4e6   :  { %3884 = vsyncpa [#allocation10], 1 }
 0x4e7   :  { %3885 = vsyncpa [#allocation5], 1 }
 0x4e8   :  { %3887 = vsyncpa [#allocation5 + $0x1], 1 }

</bundles_post_ra>
